<compile_context>
chip_gen: v5e
topology: v5e:2x2
jax: 0.10.0
libtpu: 0.0.40
codegen_flags: <defaults>
</compile_context>

<pallas_src>
import math

import jax
import jax.numpy as jnp
from jax.experimental import pallas as pl
from jax.experimental.pallas import tpu as pltpu


def _round_up(a, m):
    return (a + m - 1) // m * m


# ----------------------------------------------------------------------------
# Pallas kernels
# ----------------------------------------------------------------------------
def _conv_relu_pool_kernel(x_ref, w_ref, b_ref, o_ref):
    """Fused im2col-matmul + bias + ReLU + 2x2 max-pool.

    x_ref: (4, TG, K)  axis 0 = the 4 taps of each pooling window
    w_ref: (K, N)      b_ref: (1, N)      o_ref: (TG, N)
    """
    taps = x_ref.shape[0]
    w = w_ref[...]
    b = b_ref[...]
    res = jnp.maximum(
        jnp.dot(x_ref[0], w, preferred_element_type=jnp.float32) + b, 0.0)
    for t in range(1, taps):
        cur = jnp.maximum(
            jnp.dot(x_ref[t], w, preferred_element_type=jnp.float32) + b, 0.0)
        res = jnp.maximum(res, cur)
    o_ref[...] = res.astype(o_ref.dtype)


def _fc_stack_kernel(x_ref, w1_ref, b1_ref, w2_ref, b2_ref, w3_ref, b3_ref,
                     o_ref):
    """out = (relu(relu(x@w1+b1)@w2+b2))@w3+b3 — all three FC layers fused."""
    h = jnp.dot(x_ref[...], w1_ref[...], preferred_element_type=jnp.float32)
    h = jnp.maximum(h + b1_ref[...], 0.0)
    h = jnp.dot(h, w2_ref[...], preferred_element_type=jnp.float32)
    h = jnp.maximum(h + b2_ref[...], 0.0)
    o = jnp.dot(h, w3_ref[...], preferred_element_type=jnp.float32)
    o_ref[...] = (o + b3_ref[...]).astype(o_ref.dtype)


# ----------------------------------------------------------------------------
# pallas_call wrappers
# ----------------------------------------------------------------------------
def conv_relu_pool(patches, w, b):
    """patches: (4, G, K), w: (K, 128), b: (1, 128) -> (G, 128)."""
    taps, G, K = patches.shape
    N = w.shape[1]
    num_tiles = 2 if G >= 128 else 1          # 2 tiles -> both TCs on v7x
    TG = _round_up(pl.cdiv(G, num_tiles), 8)
    G_pad = TG * num_tiles
    if G_pad != G:
        patches = jnp.pad(patches, ((0, 0), (0, G_pad - G), (0, 0)))

    out = pl.pallas_call(
        _conv_relu_pool_kernel,
        out_shape=jax.ShapeDtypeStruct((G_pad, N), jnp.float32),
        grid=(num_tiles,),
        in_specs=[
            pl.BlockSpec((taps, TG, K), lambda i: (0, i, 0)),
            pl.BlockSpec((K, N), lambda i: (0, 0)),
            pl.BlockSpec((1, N), lambda i: (0, 0)),
        ],
        out_specs=pl.BlockSpec((TG, N), lambda i: (i, 0)),
        compiler_params=pltpu.CompilerParams(
            dimension_semantics=("parallel",)),
    )(patches, w, b)
    return out[:G] if G_pad != G else out


def fc_stack(x, w1, b1, w2, b2, w3, b3):
    """Fused fc1->relu->fc2->relu->fc3 on padded (M, 512) activations."""
    M, K = x.shape
    M_pad = _round_up(M, 8)
    if M_pad != M:
        x = jnp.pad(x, ((0, M_pad - M), (0, 0)))
    N1, N2, N3 = w1.shape[1], w2.shape[1], w3.shape[1]

    out = pl.pallas_call(
        _fc_stack_kernel,
        out_shape=jax.ShapeDtypeStruct((M_pad, N3), jnp.float32),
        grid=(1,),
        in_specs=[
            pl.BlockSpec((M_pad, K), lambda i: (0, 0)),
            pl.BlockSpec((K, N1), lambda i: (0, 0)),
            pl.BlockSpec((1, N1), lambda i: (0, 0)),
            pl.BlockSpec((N1, N2), lambda i: (0, 0)),
            pl.BlockSpec((1, N2), lambda i: (0, 0)),
            pl.BlockSpec((N2, N3), lambda i: (0, 0)),
            pl.BlockSpec((1, N3), lambda i: (0, 0)),
        ],
        out_specs=pl.BlockSpec((M_pad, N3), lambda i: (0, 0)),
    )(x, w1, b1, w2, b2, w3, b3)
    return out[:M]


# ----------------------------------------------------------------------------
# JAX glue: im2col with the 4 pooling-window taps as a leading axis
# ----------------------------------------------------------------------------
def im2col_taps(x, k, pool, k_pad):
    """x: (B, H, W, C) NHWC -> (pool*pool, B*PH*PW, k_pad).

    Rows along axis 1 are ordered (b, ph, pw); axis 0 enumerates (i, j), the
    position inside each 2x2 pooling window; columns ordered (dy, dx, c) and
    zero-padded up to k_pad.
    """
    B, H, W, C = x.shape
    OH, OW = H - k + 1, W - k + 1
    PH, PW = OH // pool, OW // pool
    patches = jnp.stack(
        [x[:, dy:dy + OH, dx:dx + OW, :] for dy in range(k) for dx in range(k)],
        axis=-2,
    )  # (B, OH, OW, k*k, C)
    KC = k * k * C
    patches = patches.reshape(B, OH, OW, KC)
    patches = patches.reshape(B, PH, pool, PW, pool, KC)
    patches = patches.transpose(2, 4, 0, 1, 3, 5)      # (pool, pool, B, PH, PW, KC)
    patches = patches.reshape(pool * pool, B * PH * PW, KC)
    if k_pad > KC:
        patches = jnp.pad(patches, ((0, 0), (0, 0), (0, k_pad - KC)))
    return patches


# ----------------------------------------------------------------------------
# THNet forward (Pallas)
# ----------------------------------------------------------------------------
def thnet_forward(x_nchw, pp):
    x = jnp.transpose(x_nchw, (0, 2, 3, 1)).astype(jnp.float32)  # NCHW -> NHWC
    B = x.shape[0]

    # conv1 (3->6, 5x5) + ReLU + 2x2 maxpool, fused in one kernel
    p1 = im2col_taps(x, 5, 2, 128)                       # (4, B*196, 128)
    a1 = conv_relu_pool(p1, pp["w1"], pp["b1"])          # (B*196, 128)
    a1 = a1.reshape(B, 14, 14, 128)[..., :6]             # real channels

    # conv2 (6->16, 5x5) + ReLU + 2x2 maxpool
    p2 = im2col_taps(a1, 5, 2, 256)                      # (4, B*25, 256)
    a2 = conv_relu_pool(p2, pp["w2"], pp["b2"])          # (B*25, 128)
    a2 = a2.reshape(B, 5, 5, 128)[..., :16]

    # flatten exactly like PyTorch's x.view(-1, 16*5*5): (C, H, W) order
    flat = jnp.transpose(a2, (0, 3, 1, 2)).reshape(B, 16 * 5 * 5)
    flat = jnp.pad(flat, ((0, 0), (0, 512 - 400)))       # K 400 -> 512

    out = fc_stack(flat, pp["fc1_w"], pp["fc1_b"], pp["fc2_w"], pp["fc2_b"],
                   pp["fc3_w"], pp["fc3_b"])             # (B, 128)
    return out[:, :10]


# ----------------------------------------------------------------------------
# Pure-JAX reference (for correctness check)
# ----------------------------------------------------------------------------
def thnet_reference(x_nchw, params):
    x = jnp.transpose(x_nchw, (0, 2, 3, 1)).astype(jnp.float32)

    def conv(x, w, b):
        y = jax.lax.conv_general_dilated(
            x, w, (1, 1), "VALID", dimension_numbers=("NHWC", "HWIO", "NHWC"))
        return y + b

    def pool(x):
        return jax.lax.reduce_window(
            x, -jnp.inf, jax.lax.max, (1, 2, 2, 1), (1, 2, 2, 1), "VALID")

    w1 = params["w1"].reshape(5, 5, 3, 6)
    w2 = params["w2"].reshape(5, 5, 6, 16)
    x = pool(jax.nn.relu(conv(x, w1, params["b1"])))
    x = pool(jax.nn.relu(conv(x, w2, params["b2"])))
    x = jnp.transpose(x, (0, 3, 1, 2)).reshape(x.shape[0], -1)
    x = jax.nn.relu(x @ params["fc1_w"] + params["fc1_b"])
    x = jax.nn.relu(x @ params["fc2_w"] + params["fc2_b"])
    return x @ params["fc3_w"] + params["fc3_b"]


# ----------------------------------------------------------------------------
# Parameter init (PyTorch-default-like uniform(-1/sqrt(fan_in))) + lane padding
# ----------------------------------------------------------------------------
def init_params(key):
    ks = jax.random.split(key, 10)

    def u(k, shape, fan_in):
        bound = 1.0 / math.sqrt(fan_in)
        return jax.random.uniform(k, shape, jnp.float32, -bound, bound)

    return {
        # conv weights stored flattened for the im2col matmul: (kh*kw*cin, cout)
        "w1": u(ks[0], (5 * 5 * 3, 6), 5 * 5 * 3),
        "b1": u(ks[1], (6,), 5 * 5 * 3),
        "w2": u(ks[2], (5 * 5 * 6, 16), 5 * 5 * 6),
        "b2": u(ks[3], (16,), 5 * 5 * 6),
        "fc1_w": u(ks[4], (400, 120), 400),
        "fc1_b": u(ks[5], (120,), 400),
        "fc2_w": u(ks[6], (120, 84), 120),
        "fc2_b": u(ks[7], (84,), 120),
        "fc3_w": u(ks[8], (84, 10), 84),
        "fc3_b": u(ks[9], (10,), 84),
    }


def pad_params(p):
    """Zero-pad weights/biases once so every kernel operand is (8,128)-aligned."""

    def pad_w(w, k_pad, n_pad):
        K, N = w.shape
        return jnp.pad(w, ((0, k_pad - K), (0, n_pad - N)))

    def pad_b(b, n_pad):
        return jnp.pad(b, (0, n_pad - b.shape[0])).reshape(1, n_pad)

    return {
        "w1": pad_w(p["w1"], 128, 128),
        "b1": pad_b(p["b1"], 128),
        "w2": pad_w(p["w2"], 256, 128),
        "b2": pad_b(p["b2"], 128),
        "fc1_w": pad_w(p["fc1_w"], 512, 128),
        "fc1_b": pad_b(p["fc1_b"], 128),
        "fc2_w": pad_w(p["fc2_w"], 128, 128),
        "fc2_b": pad_b(p["fc2_b"], 128),
        "fc3_w": pad_w(p["fc3_w"], 128, 128),
        "fc3_b": pad_b(p["fc3_b"], 128),
    }


if __name__ == "__main__":
    key = jax.random.PRNGKey(0)
    k_param, k_x = jax.random.split(key)
    params = init_params(k_param)
    padded = pad_params(params)

    # Input shape forced by the module: fc1 expects 16*5*5 -> 32x32 images.
    x = jax.random.normal(k_x, (2, 3, 32, 32), jnp.float32)

    forward = jax.jit(thnet_forward)
    out = jax.block_until_ready(forward(x, padded))
    assert out.shape == (2, 10), out.shape

    ref = jax.block_until_ready(thnet_reference(x, params))
    max_err = float(jnp.max(jnp.abs(out - ref)))
    assert max_err < 1e-2, f"mismatch vs reference: {max_err}"

    print("KERNEL_OK")
</pallas_src>

<mosaic_0001>
module attributes {stable_mosaic.version = 11 : i64} {
  func.func @_conv_relu_pool_kernel(%arg0: i32, %arg1: memref<4x200x128xf32, #tpu.memory_space<vmem>>, %arg2: memref<128x128xf32, #tpu.memory_space<vmem>>, %arg3: memref<1x128xf32, #tpu.memory_space<vmem>>, %arg4: memref<200x128xf32, #tpu.memory_space<vmem>>) attributes {dimension_semantics = [#tpu.dimension_semantics<parallel>], iteration_bounds = array<i64: 2>, scalar_prefetch = 0 : i64, scratch_operands = 0 : i64, tpu.core_type = #tpu.core_type<tc>, window_params = [{transform_indices = @transform_0, window_bounds = array<i64: 4, 200, 128>}, {pipeline_mode = #tpu.pipeline_mode<synchronous>, transform_indices = @transform_1, window_bounds = array<i64: 128, 128>}, {pipeline_mode = #tpu.pipeline_mode<synchronous>, transform_indices = @transform_2, window_bounds = array<i64: 1, 128>}, {transform_indices = @transform_3, window_bounds = array<i64: 200, 128>}]} {
    %c0 = arith.constant 0 : index
    %c0_0 = arith.constant 0 : index
    %0 = vector.load %arg2[%c0, %c0_0] : memref<128x128xf32, #tpu.memory_space<vmem>>, vector<128x128xf32>
    %c0_1 = arith.constant 0 : index
    %c0_2 = arith.constant 0 : index
    %1 = vector.load %arg3[%c0_1, %c0_2] : memref<1x128xf32, #tpu.memory_space<vmem>>, vector<1x128xf32>
    %c0_3 = arith.constant 0 : index
    %c0_4 = arith.constant 0 : index
    %c0_5 = arith.constant 0 : index
    %2 = vector.load %arg1[%c0_3, %c0_4, %c0_5] : memref<4x200x128xf32, #tpu.memory_space<vmem>>, vector<1x200x128xf32>
    %3 = vector.shape_cast %2 : vector<1x200x128xf32> to vector<200x128xf32>
    %cst = arith.constant dense<0.000000e+00> : vector<200x128xf32>
    %4 = tpu.matmul %3, %0, %cst {dimension_numbers = #tpu.dot_dimension_numbers<[1], [0], [0], [1], [0, 0, 1, 1], [], []>} : vector<200x128xf32>, vector<128x128xf32>, vector<200x128xf32> -> vector<200x128xf32>
    %5 = vector.broadcast %1 : vector<1x128xf32> to vector<200x128xf32>
    %6 = arith.addf %4, %5 : vector<200x128xf32>
    %cst_6 = arith.constant 0.000000e+00 : f32
    %7 = vector.broadcast %cst_6 : f32 to vector<200x128xf32>
    %8 = arith.maximumf %6, %7 : vector<200x128xf32>
    %c1 = arith.constant 1 : index
    %c0_7 = arith.constant 0 : index
    %c0_8 = arith.constant 0 : index
    %9 = vector.load %arg1[%c1, %c0_7, %c0_8] : memref<4x200x128xf32, #tpu.memory_space<vmem>>, vector<1x200x128xf32>
    %10 = vector.shape_cast %9 : vector<1x200x128xf32> to vector<200x128xf32>
    %cst_9 = arith.constant dense<0.000000e+00> : vector<200x128xf32>
    %11 = tpu.matmul %10, %0, %cst_9 {dimension_numbers = #tpu.dot_dimension_numbers<[1], [0], [0], [1], [0, 0, 1, 1], [], []>} : vector<200x128xf32>, vector<128x128xf32>, vector<200x128xf32> -> vector<200x128xf32>
    %12 = vector.broadcast %1 : vector<1x128xf32> to vector<200x128xf32>
    %13 = arith.addf %11, %12 : vector<200x128xf32>
    %cst_10 = arith.constant 0.000000e+00 : f32
    %14 = vector.broadcast %cst_10 : f32 to vector<200x128xf32>
    %15 = arith.maximumf %13, %14 : vector<200x128xf32>
    %16 = arith.maximumf %8, %15 : vector<200x128xf32>
    %c2 = arith.constant 2 : index
    %c0_11 = arith.constant 0 : index
    %c0_12 = arith.constant 0 : index
    %17 = vector.load %arg1[%c2, %c0_11, %c0_12] : memref<4x200x128xf32, #tpu.memory_space<vmem>>, vector<1x200x128xf32>
    %18 = vector.shape_cast %17 : vector<1x200x128xf32> to vector<200x128xf32>
    %cst_13 = arith.constant dense<0.000000e+00> : vector<200x128xf32>
    %19 = tpu.matmul %18, %0, %cst_13 {dimension_numbers = #tpu.dot_dimension_numbers<[1], [0], [0], [1], [0, 0, 1, 1], [], []>} : vector<200x128xf32>, vector<128x128xf32>, vector<200x128xf32> -> vector<200x128xf32>
    %20 = vector.broadcast %1 : vector<1x128xf32> to vector<200x128xf32>
    %21 = arith.addf %19, %20 : vector<200x128xf32>
    %cst_14 = arith.constant 0.000000e+00 : f32
    %22 = vector.broadcast %cst_14 : f32 to vector<200x128xf32>
    %23 = arith.maximumf %21, %22 : vector<200x128xf32>
    %24 = arith.maximumf %16, %23 : vector<200x128xf32>
    %c3 = arith.constant 3 : index
    %c0_15 = arith.constant 0 : index
    %c0_16 = arith.constant 0 : index
    %25 = vector.load %arg1[%c3, %c0_15, %c0_16] : memref<4x200x128xf32, #tpu.memory_space<vmem>>, vector<1x200x128xf32>
    %26 = vector.shape_cast %25 : vector<1x200x128xf32> to vector<200x128xf32>
    %cst_17 = arith.constant dense<0.000000e+00> : vector<200x128xf32>
    %27 = tpu.matmul %26, %0, %cst_17 {dimension_numbers = #tpu.dot_dimension_numbers<[1], [0], [0], [1], [0, 0, 1, 1], [], []>} : vector<200x128xf32>, vector<128x128xf32>, vector<200x128xf32> -> vector<200x128xf32>
    %28 = vector.broadcast %1 : vector<1x128xf32> to vector<200x128xf32>
    %29 = arith.addf %27, %28 : vector<200x128xf32>
    %cst_18 = arith.constant 0.000000e+00 : f32
    %30 = vector.broadcast %cst_18 : f32 to vector<200x128xf32>
    %31 = arith.maximumf %29, %30 : vector<200x128xf32>
    %32 = arith.maximumf %24, %31 : vector<200x128xf32>
    %c0_19 = arith.constant 0 : index
    %c0_20 = arith.constant 0 : index
    %33 = vector.load %arg4[%c0_19, %c0_20] : memref<200x128xf32, #tpu.memory_space<vmem>>, vector<200x128xf32>
    tpu.vector_store %arg4[%c0_19, %c0_20], %32 {strides = array<i32>} : memref<200x128xf32, #tpu.memory_space<vmem>>, vector<200x128xf32>,
    return
  }
  func.func @transform_0(%arg0: i32) -> (i32, i32, i32) {
    %c0_i32 = arith.constant 0 : i32
    %c0_i32_0 = arith.constant 0 : i32
    %c0_i32_1 = arith.constant 0 : i32
    return %c0_i32, %arg0, %c0_i32_0 : i32, i32, i32
  }
  func.func @transform_1(%arg0: i32) -> (i32, i32) {
    %c0_i32 = arith.constant 0 : i32
    %c0_i32_0 = arith.constant 0 : i32
    %c0_i32_1 = arith.constant 0 : i32
    return %c0_i32, %c0_i32_0 : i32, i32
  }
  func.func @transform_2(%arg0: i32) -> (i32, i32) {
    %c0_i32 = arith.constant 0 : i32
    %c0_i32_0 = arith.constant 0 : i32
    %c0_i32_1 = arith.constant 0 : i32
    return %c0_i32, %c0_i32_0 : i32, i32
  }
  func.func @transform_3(%arg0: i32) -> (i32, i32) {
    %c0_i32 = arith.constant 0 : i32
    %c0_i32_0 = arith.constant 0 : i32
    return %arg0, %c0_i32 : i32, i32
  }
}

module attributes {stable_mosaic.version = 11 : i64} {
  func.func @_conv_relu_pool_kernel(%arg0: i32, %arg1: memref<4x56x256xf32, #tpu.memory_space<vmem>>, %arg2: memref<256x128xf32, #tpu.memory_space<vmem>>, %arg3: memref<1x128xf32, #tpu.memory_space<vmem>>, %arg4: memref<56x128xf32, #tpu.memory_space<vmem>>) attributes {dimension_semantics = [#tpu.dimension_semantics<parallel>], iteration_bounds = array<i64: 1>, scalar_prefetch = 0 : i64, scratch_operands = 0 : i64, tpu.core_type = #tpu.core_type<tc>, window_params = [{transform_indices = @transform_0, window_bounds = array<i64: 4, 56, 256>}, {pipeline_mode = #tpu.pipeline_mode<synchronous>, transform_indices = @transform_1, window_bounds = array<i64: 256, 128>}, {pipeline_mode = #tpu.pipeline_mode<synchronous>, transform_indices = @transform_2, window_bounds = array<i64: 1, 128>}, {transform_indices = @transform_3, window_bounds = array<i64: 56, 128>}]} {
    %c0 = arith.constant 0 : index
    %c0_0 = arith.constant 0 : index
    %0 = vector.load %arg2[%c0, %c0_0] : memref<256x128xf32, #tpu.memory_space<vmem>>, vector<256x128xf32>
    %c0_1 = arith.constant 0 : index
    %c0_2 = arith.constant 0 : index
    %1 = vector.load %arg3[%c0_1, %c0_2] : memref<1x128xf32, #tpu.memory_space<vmem>>, vector<1x128xf32>
    %c0_3 = arith.constant 0 : index
    %c0_4 = arith.constant 0 : index
    %c0_5 = arith.constant 0 : index
    %2 = vector.load %arg1[%c0_3, %c0_4, %c0_5] : memref<4x56x256xf32, #tpu.memory_space<vmem>>, vector<1x56x256xf32>
    %3 = vector.shape_cast %2 : vector<1x56x256xf32> to vector<56x256xf32>
    %cst = arith.constant dense<0.000000e+00> : vector<56x128xf32>
    %4 = tpu.matmul %3, %0, %cst {dimension_numbers = #tpu.dot_dimension_numbers<[1], [0], [0], [1], [0, 0, 1, 1], [], []>} : vector<56x256xf32>, vector<256x128xf32>, vector<56x128xf32> -> vector<56x128xf32>
    %5 = vector.broadcast %1 : vector<1x128xf32> to vector<56x128xf32>
    %6 = arith.addf %4, %5 : vector<56x128xf32>
    %cst_6 = arith.constant 0.000000e+00 : f32
    %7 = vector.broadcast %cst_6 : f32 to vector<56x128xf32>
    %8 = arith.maximumf %6, %7 : vector<56x128xf32>
    %c1 = arith.constant 1 : index
    %c0_7 = arith.constant 0 : index
    %c0_8 = arith.constant 0 : index
    %9 = vector.load %arg1[%c1, %c0_7, %c0_8] : memref<4x56x256xf32, #tpu.memory_space<vmem>>, vector<1x56x256xf32>
    %10 = vector.shape_cast %9 : vector<1x56x256xf32> to vector<56x256xf32>
    %cst_9 = arith.constant dense<0.000000e+00> : vector<56x128xf32>
    %11 = tpu.matmul %10, %0, %cst_9 {dimension_numbers = #tpu.dot_dimension_numbers<[1], [0], [0], [1], [0, 0, 1, 1], [], []>} : vector<56x256xf32>, vector<256x128xf32>, vector<56x128xf32> -> vector<56x128xf32>
    %12 = vector.broadcast %1 : vector<1x128xf32> to vector<56x128xf32>
    %13 = arith.addf %11, %12 : vector<56x128xf32>
    %cst_10 = arith.constant 0.000000e+00 : f32
    %14 = vector.broadcast %cst_10 : f32 to vector<56x128xf32>
    %15 = arith.maximumf %13, %14 : vector<56x128xf32>
    %16 = arith.maximumf %8, %15 : vector<56x128xf32>
    %c2 = arith.constant 2 : index
    %c0_11 = arith.constant 0 : index
    %c0_12 = arith.constant 0 : index
    %17 = vector.load %arg1[%c2, %c0_11, %c0_12] : memref<4x56x256xf32, #tpu.memory_space<vmem>>, vector<1x56x256xf32>
    %18 = vector.shape_cast %17 : vector<1x56x256xf32> to vector<56x256xf32>
    %cst_13 = arith.constant dense<0.000000e+00> : vector<56x128xf32>
    %19 = tpu.matmul %18, %0, %cst_13 {dimension_numbers = #tpu.dot_dimension_numbers<[1], [0], [0], [1], [0, 0, 1, 1], [], []>} : vector<56x256xf32>, vector<256x128xf32>, vector<56x128xf32> -> vector<56x128xf32>
    %20 = vector.broadcast %1 : vector<1x128xf32> to vector<56x128xf32>
    %21 = arith.addf %19, %20 : vector<56x128xf32>
    %cst_14 = arith.constant 0.000000e+00 : f32
    %22 = vector.broadcast %cst_14 : f32 to vector<56x128xf32>
    %23 = arith.maximumf %21, %22 : vector<56x128xf32>
    %24 = arith.maximumf %16, %23 : vector<56x128xf32>
    %c3 = arith.constant 3 : index
    %c0_15 = arith.constant 0 : index
    %c0_16 = arith.constant 0 : index
    %25 = vector.load %arg1[%c3, %c0_15, %c0_16] : memref<4x56x256xf32, #tpu.memory_space<vmem>>, vector<1x56x256xf32>
    %26 = vector.shape_cast %25 : vector<1x56x256xf32> to vector<56x256xf32>
    %cst_17 = arith.constant dense<0.000000e+00> : vector<56x128xf32>
    %27 = tpu.matmul %26, %0, %cst_17 {dimension_numbers = #tpu.dot_dimension_numbers<[1], [0], [0], [1], [0, 0, 1, 1], [], []>} : vector<56x256xf32>, vector<256x128xf32>, vector<56x128xf32> -> vector<56x128xf32>
    %28 = vector.broadcast %1 : vector<1x128xf32> to vector<56x128xf32>
    %29 = arith.addf %27, %28 : vector<56x128xf32>
    %cst_18 = arith.constant 0.000000e+00 : f32
    %30 = vector.broadcast %cst_18 : f32 to vector<56x128xf32>
    %31 = arith.maximumf %29, %30 : vector<56x128xf32>
    %32 = arith.maximumf %24, %31 : vector<56x128xf32>
    %c0_19 = arith.constant 0 : index
    %c0_20 = arith.constant 0 : index
    %33 = vector.load %arg4[%c0_19, %c0_20] : memref<56x128xf32, #tpu.memory_space<vmem>>, vector<56x128xf32>
    tpu.vector_store %arg4[%c0_19, %c0_20], %32 {strides = array<i32>} : memref<56x128xf32, #tpu.memory_space<vmem>>, vector<56x128xf32>,
    return
  }
  func.func @transform_0(%arg0: i32) -> (i32, i32, i32) {
    %c0_i32 = arith.constant 0 : i32
    %c0_i32_0 = arith.constant 0 : i32
    %c0_i32_1 = arith.constant 0 : i32
    return %c0_i32, %arg0, %c0_i32_0 : i32, i32, i32
  }
  func.func @transform_1(%arg0: i32) -> (i32, i32) {
    %c0_i32 = arith.constant 0 : i32
    %c0_i32_0 = arith.constant 0 : i32
    %c0_i32_1 = arith.constant 0 : i32
    return %c0_i32, %c0_i32_0 : i32, i32
  }
  func.func @transform_2(%arg0: i32) -> (i32, i32) {
    %c0_i32 = arith.constant 0 : i32
    %c0_i32_0 = arith.constant 0 : i32
    %c0_i32_1 = arith.constant 0 : i32
    return %c0_i32, %c0_i32_0 : i32, i32
  }
  func.func @transform_3(%arg0: i32) -> (i32, i32) {
    %c0_i32 = arith.constant 0 : i32
    %c0_i32_0 = arith.constant 0 : i32
    return %arg0, %c0_i32 : i32, i32
  }
}

module attributes {stable_mosaic.version = 11 : i64} {
  func.func @_fc_stack_kernel(%arg0: i32, %arg1: memref<8x512xf32, #tpu.memory_space<vmem>>, %arg2: memref<512x128xf32, #tpu.memory_space<vmem>>, %arg3: memref<1x128xf32, #tpu.memory_space<vmem>>, %arg4: memref<128x128xf32, #tpu.memory_space<vmem>>, %arg5: memref<1x128xf32, #tpu.memory_space<vmem>>, %arg6: memref<128x128xf32, #tpu.memory_space<vmem>>, %arg7: memref<1x128xf32, #tpu.memory_space<vmem>>, %arg8: memref<8x128xf32, #tpu.memory_space<vmem>>) attributes {dimension_semantics = [#tpu.dimension_semantics<arbitrary>], iteration_bounds = array<i64: 1>, scalar_prefetch = 0 : i64, scratch_operands = 0 : i64, tpu.core_type = #tpu.core_type<tc>, window_params = [{pipeline_mode = #tpu.pipeline_mode<synchronous>, transform_indices = @transform_0, window_bounds = array<i64: 8, 512>}, {pipeline_mode = #tpu.pipeline_mode<synchronous>, transform_indices = @transform_1, window_bounds = array<i64: 512, 128>}, {pipeline_mode = #tpu.pipeline_mode<synchronous>, transform_indices = @transform_2, window_bounds = array<i64: 1, 128>}, {pipeline_mode = #tpu.pipeline_mode<synchronous>, transform_indices = @transform_3, window_bounds = array<i64: 128, 128>}, {pipeline_mode = #tpu.pipeline_mode<synchronous>, transform_indices = @transform_4, window_bounds = array<i64: 1, 128>}, {pipeline_mode = #tpu.pipeline_mode<synchronous>, transform_indices = @transform_5, window_bounds = array<i64: 128, 128>}, {pipeline_mode = #tpu.pipeline_mode<synchronous>, transform_indices = @transform_6, window_bounds = array<i64: 1, 128>}, {pipeline_mode = #tpu.pipeline_mode<synchronous>, transform_indices = @transform_7, window_bounds = array<i64: 8, 128>}]} {
    %c0 = arith.constant 0 : index
    %c0_0 = arith.constant 0 : index
    %0 = vector.load %arg1[%c0, %c0_0] : memref<8x512xf32, #tpu.memory_space<vmem>>, vector<8x512xf32>
    %c0_1 = arith.constant 0 : index
    %c0_2 = arith.constant 0 : index
    %1 = vector.load %arg2[%c0_1, %c0_2] : memref<512x128xf32, #tpu.memory_space<vmem>>, vector<512x128xf32>
    %cst = arith.constant dense<0.000000e+00> : vector<8x128xf32>
    %2 = tpu.matmul %0, %1, %cst {dimension_numbers = #tpu.dot_dimension_numbers<[1], [0], [0], [1], [0, 0, 1, 1], [], []>} : vector<8x512xf32>, vector<512x128xf32>, vector<8x128xf32> -> vector<8x128xf32>
    %c0_3 = arith.constant 0 : index
    %c0_4 = arith.constant 0 : index
    %3 = vector.load %arg3[%c0_3, %c0_4] : memref<1x128xf32, #tpu.memory_space<vmem>>, vector<1x128xf32>
    %4 = vector.broadcast %3 : vector<1x128xf32> to vector<8x128xf32>
    %5 = arith.addf %2, %4 : vector<8x128xf32>
    %cst_5 = arith.constant 0.000000e+00 : f32
    %6 = vector.broadcast %cst_5 : f32 to vector<8x128xf32>
    %7 = arith.maximumf %5, %6 : vector<8x128xf32>
    %c0_6 = arith.constant 0 : index
    %c0_7 = arith.constant 0 : index
    %8 = vector.load %arg4[%c0_6, %c0_7] : memref<128x128xf32, #tpu.memory_space<vmem>>, vector<128x128xf32>
    %cst_8 = arith.constant dense<0.000000e+00> : vector<8x128xf32>
    %9 = tpu.matmul %7, %8, %cst_8 {dimension_numbers = #tpu.dot_dimension_numbers<[1], [0], [0], [1], [0, 0, 1, 1], [], []>} : vector<8x128xf32>, vector<128x128xf32>, vector<8x128xf32> -> vector<8x128xf32>
    %c0_9 = arith.constant 0 : index
    %c0_10 = arith.constant 0 : index
    %10 = vector.load %arg5[%c0_9, %c0_10] : memref<1x128xf32, #tpu.memory_space<vmem>>, vector<1x128xf32>
    %11 = vector.broadcast %10 : vector<1x128xf32> to vector<8x128xf32>
    %12 = arith.addf %9, %11 : vector<8x128xf32>
    %cst_11 = arith.constant 0.000000e+00 : f32
    %13 = vector.broadcast %cst_11 : f32 to vector<8x128xf32>
    %14 = arith.maximumf %12, %13 : vector<8x128xf32>
    %c0_12 = arith.constant 0 : index
    %c0_13 = arith.constant 0 : index
    %15 = vector.load %arg6[%c0_12, %c0_13] : memref<128x128xf32, #tpu.memory_space<vmem>>, vector<128x128xf32>
    %cst_14 = arith.constant dense<0.000000e+00> : vector<8x128xf32>
    %16 = tpu.matmul %14, %15, %cst_14 {dimension_numbers = #tpu.dot_dimension_numbers<[1], [0], [0], [1], [0, 0, 1, 1], [], []>} : vector<8x128xf32>, vector<128x128xf32>, vector<8x128xf32> -> vector<8x128xf32>
    %c0_15 = arith.constant 0 : index
    %c0_16 = arith.constant 0 : index
    %17 = vector.load %arg7[%c0_15, %c0_16] : memref<1x128xf32, #tpu.memory_space<vmem>>, vector<1x128xf32>
    %18 = vector.broadcast %17 : vector<1x128xf32> to vector<8x128xf32>
    %19 = arith.addf %16, %18 : vector<8x128xf32>
    %c0_17 = arith.constant 0 : index
    %c0_18 = arith.constant 0 : index
    %20 = vector.load %arg8[%c0_17, %c0_18] : memref<8x128xf32, #tpu.memory_space<vmem>>, vector<8x128xf32>
    tpu.vector_store %arg8[%c0_17, %c0_18], %19 {strides = array<i32>} : memref<8x128xf32, #tpu.memory_space<vmem>>, vector<8x128xf32>,
    return
  }
  func.func @transform_0(%arg0: i32) -> (i32, i32) {
    %c0_i32 = arith.constant 0 : i32
    %c0_i32_0 = arith.constant 0 : i32
    %c0_i32_1 = arith.constant 0 : i32
    return %c0_i32, %c0_i32_0 : i32, i32
  }
  func.func @transform_1(%arg0: i32) -> (i32, i32) {
    %c0_i32 = arith.constant 0 : i32
    %c0_i32_0 = arith.constant 0 : i32
    %c0_i32_1 = arith.constant 0 : i32
    return %c0_i32, %c0_i32_0 : i32, i32
  }
  func.func @transform_2(%arg0: i32) -> (i32, i32) {
    %c0_i32 = arith.constant 0 : i32
    %c0_i32_0 = arith.constant 0 : i32
    %c0_i32_1 = arith.constant 0 : i32
    return %c0_i32, %c0_i32_0 : i32, i32
  }
  func.func @transform_3(%arg0: i32) -> (i32, i32) {
    %c0_i32 = arith.constant 0 : i32
    %c0_i32_0 = arith.constant 0 : i32
    %c0_i32_1 = arith.constant 0 : i32
    return %c0_i32, %c0_i32_0 : i32, i32
  }
  func.func @transform_4(%arg0: i32) -> (i32, i32) {
    %c0_i32 = arith.constant 0 : i32
    %c0_i32_0 = arith.constant 0 : i32
    %c0_i32_1 = arith.constant 0 : i32
    return %c0_i32, %c0_i32_0 : i32, i32
  }
  func.func @transform_5(%arg0: i32) -> (i32, i32) {
    %c0_i32 = arith.constant 0 : i32
    %c0_i32_0 = arith.constant 0 : i32
    %c0_i32_1 = arith.constant 0 : i32
    return %c0_i32, %c0_i32_0 : i32, i32
  }
  func.func @transform_6(%arg0: i32) -> (i32, i32) {
    %c0_i32 = arith.constant 0 : i32
    %c0_i32_0 = arith.constant 0 : i32
    %c0_i32_1 = arith.constant 0 : i32
    return %c0_i32, %c0_i32_0 : i32, i32
  }
  func.func @transform_7(%arg0: i32) -> (i32, i32) {
    %c0_i32 = arith.constant 0 : i32
    %c0_i32_0 = arith.constant 0 : i32
    %c0_i32_1 = arith.constant 0 : i32
    return %c0_i32, %c0_i32_0 : i32, i32
  }
}

</mosaic_0001>

<bundles_post_ra>
// kernel: thnet_forward.3
= control target key start
LH: loop header
LB: loop body
LE: loop exit
PB: predicated region body
PF: predicated region fallthrough
CT: control target
= control target key end

     0   :  { %s1514_s12 = smov 0   ;;  %s1516_s13 = smov 0   ;;  %s2052_s0 = inlined_call_operand.vmem [shape: f32[4,400,128], index: 0, kind: input, shape index: {}]   ;;  %s2053_s1 = inlined_call_operand.vmem [shape: f32[128,128], index: 1, kind: input, shape index: {}]   ;;  %s2054_s2 = inlined_call_operand.vmem [shape: f32[1,128], index: 2, kind: input, shape index: {}]   ;;  %s2055_s3 = inlined_call_operand.vmem [shape: f32[400,128], index: 3, kind: output, shape index: {}]  }
   0x1   :  { %s1518_s14 = smov 0  }
   0x2 LB: > { %s1358_s15 = sadd.s32 4294967295, %s1492_s14   ;;  %s1531_s16 = sadd.s32 1, %s1492_s14   ;;  %s1492_s14 = sphi %s1518_s14, %s2058_s14   ;;  %s1488_s13 = sphi %s1516_s13, %s2057_s13   ;;  %s1484_s12 = sphi %s1514_s12, %s2056_s12  }
   0x3   : > { %s17_s17 = ssub.s32 %s1492_s14, %s1531_s16  ;;  %s20_s18 = sadd.s32 1, %s1488_s13 }
   0x4   : > { %p18_p0 = scmp.eq.s32.totalorder %s17_s17, 0  ;;  %p27_p1 = scmp.ne.s32.totalorder %s1488_s13, %s1484_s12 }
   0x5   : > { %p28_p2 = scmp.eq.s32.totalorder %s1492_s14, 0  ;;  %p1361_p4 = scmp.ge.s32.totalorder %s1492_s14, 2 }
   0x6   : > { %s1540_s19 = scalar_select %p18_p0, %s1488_s13, %s20_s18  }
   0x7   : > { %p29_p3 = por %p28_p2, %p27_p1  ;;  %127 = sbr.rel (%p1361_p4) target bundleno = 117 (0x75), region = 24 }
   0xc   : > { %130 = sbr.rel (!%p29_p3) target bundleno = 117 (0x75), region = 28  ;;  %s132_s20 = sand.u32 (%p29_p3), 1, %s1488_s13  }
   0xd   : > { %s1442_s21 = smul.u32 (%p29_p3), 200, %s1492_s14 }
   0xe   : > { %s1443_s22 = smul.u32 (%p29_p3), 800, %s132_s20 }
   0xf   : > { %s1548_s25 = scalar_lea.vmem (%p29_p3), %s2052_s0, %s1442_s21 }
  0x10   : > { %v364_v0 = vld [vmem:[%s1548_s25] sm:$0xff] (%p29_p3)  ;;  %v366_v1 = vld [vmem:[%s1548_s25 + $0x8] sm:$0xff] (%p29_p3)  ;;  %v368_v2 = vld [vmem:[%s1548_s25 + $0x10] sm:$0xff] (%p29_p3)  ;;  %s1553_s26 = scalar_lea.vmem (%p29_p3), [#allocation2], %s1443_s22 }
  0x11   : > { %365 = vst [vmem:[%s1553_s26] sm:$0xff] %v364_v0  ;;  %v370_v3 = vld [vmem:[%s1548_s25 + $0x18] sm:$0xff]  ;;  %v372_v4 = vld [vmem:[%s1548_s25 + $0x20] sm:$0xff]  ;;  %v374_v5 = vld [vmem:[%s1548_s25 + $0x28] sm:$0xff] }
  0x12   : > { %367 = vst [vmem:[%s1553_s26 + $0x8] sm:$0xff] %v366_v1  ;;  %v376_v6 = vld [vmem:[%s1548_s25 + $0x30] sm:$0xff]  ;;  %v378_v7 = vld [vmem:[%s1548_s25 + $0x38] sm:$0xff]  ;;  %v380_v8 = vld [vmem:[%s1548_s25 + $0x40] sm:$0xff] }
  0x13   : > { %369 = vst [vmem:[%s1553_s26 + $0x10] sm:$0xff] %v368_v2  ;;  %v382_v9 = vld [vmem:[%s1548_s25 + $0x48] sm:$0xff]  ;;  %v384_v10 = vld [vmem:[%s1548_s25 + $0x50] sm:$0xff]  ;;  %v386_v11 = vld [vmem:[%s1548_s25 + $0x58] sm:$0xff] }
  0x14   : > { %371 = vst [vmem:[%s1553_s26 + $0x18] sm:$0xff] %v370_v3  ;;  %v388_v12 = vld [vmem:[%s1548_s25 + $0x60] sm:$0xff]  ;;  %v390_v13 = vld [vmem:[%s1548_s25 + $0x68] sm:$0xff]  ;;  %v392_v14 = vld [vmem:[%s1548_s25 + $0x70] sm:$0xff] }
  0x15   : > { %373 = vst [vmem:[%s1553_s26 + $0x20] sm:$0xff] %v372_v4  ;;  %v394_v15 = vld [vmem:[%s1548_s25 + $0x78] sm:$0xff]  ;;  %v396_v16 = vld [vmem:[%s1548_s25 + $0x80] sm:$0xff]  ;;  %v398_v17 = vld [vmem:[%s1548_s25 + $0x88] sm:$0xff] }
  0x16   : > { %375 = vst [vmem:[%s1553_s26 + $0x28] sm:$0xff] %v374_v5  ;;  %v400_v18 = vld [vmem:[%s1548_s25 + $0x90] sm:$0xff]  ;;  %v402_v19 = vld [vmem:[%s1548_s25 + $0x98] sm:$0xff]  ;;  %v404_v20 = vld [vmem:[%s1548_s25 + $0xa0] sm:$0xff] }
  0x17   : > { %377 = vst [vmem:[%s1553_s26 + $0x30] sm:$0xff] %v376_v6  ;;  %v406_v21 = vld [vmem:[%s1548_s25 + $0xa8] sm:$0xff]  ;;  %v408_v22 = vld [vmem:[%s1548_s25 + $0xb0] sm:$0xff]  ;;  %v410_v23 = vld [vmem:[%s1548_s25 + $0xb8] sm:$0xff] }
  0x18   : > { %379 = vst [vmem:[%s1553_s26 + $0x38] sm:$0xff] %v378_v7  ;;  %v412_v24 = vld [vmem:[%s1548_s25 + $0xc0] sm:$0xff]  ;;  %v414_v25 = vld [vmem:[%s1548_s25 + $0x190] sm:$0xff]  ;;  %v416_v26 = vld [vmem:[%s1548_s25 + $0x198] sm:$0xff] }
  0x19   : > { %381 = vst [vmem:[%s1553_s26 + $0x40] sm:$0xff] %v380_v8  ;;  %v418_v27 = vld [vmem:[%s1548_s25 + $0x1a0] sm:$0xff]  ;;  %v420_v28 = vld [vmem:[%s1548_s25 + $0x1a8] sm:$0xff]  ;;  %v422_v29 = vld [vmem:[%s1548_s25 + $0x1b0] sm:$0xff] }
  0x1a   : > { %383 = vst [vmem:[%s1553_s26 + $0x48] sm:$0xff] %v382_v9  ;;  %v424_v30 = vld [vmem:[%s1548_s25 + $0x1b8] sm:$0xff]  ;;  %v426_v31 = vld [vmem:[%s1548_s25 + $0x1c0] sm:$0xff]  ;;  %v428_v32 = vld [vmem:[%s1548_s25 + $0x1c8] sm:$0xff] }
  0x1b   : > { %385 = vst [vmem:[%s1553_s26 + $0x50] sm:$0xff] %v384_v10  ;;  %v430_v33 = vld [vmem:[%s1548_s25 + $0x1d0] sm:$0xff]  ;;  %v432_v34 = vld [vmem:[%s1548_s25 + $0x1d8] sm:$0xff]  ;;  %v434_v35 = vld [vmem:[%s1548_s25 + $0x1e0] sm:$0xff] }
  0x1c   : > { %387 = vst [vmem:[%s1553_s26 + $0x58] sm:$0xff] %v386_v11  ;;  %v436_v36 = vld [vmem:[%s1548_s25 + $0x1e8] sm:$0xff]  ;;  %v438_v37 = vld [vmem:[%s1548_s25 + $0x1f0] sm:$0xff]  ;;  %v440_v38 = vld [vmem:[%s1548_s25 + $0x1f8] sm:$0xff] }
  0x1d   : > { %389 = vst [vmem:[%s1553_s26 + $0x60] sm:$0xff] %v388_v12  ;;  %v442_v39 = vld [vmem:[%s1548_s25 + $0x200] sm:$0xff]  ;;  %v444_v40 = vld [vmem:[%s1548_s25 + $0x208] sm:$0xff]  ;;  %v446_v41 = vld [vmem:[%s1548_s25 + $0x210] sm:$0xff] }
  0x1e   : > { %391 = vst [vmem:[%s1553_s26 + $0x68] sm:$0xff] %v390_v13  ;;  %v448_v42 = vld [vmem:[%s1548_s25 + $0x218] sm:$0xff]  ;;  %v450_v43 = vld [vmem:[%s1548_s25 + $0x220] sm:$0xff]  ;;  %v452_v44 = vld [vmem:[%s1548_s25 + $0x228] sm:$0xff] }
  0x1f   : > { %393 = vst [vmem:[%s1553_s26 + $0x70] sm:$0xff] %v392_v14  ;;  %v454_v45 = vld [vmem:[%s1548_s25 + $0x230] sm:$0xff]  ;;  %v456_v46 = vld [vmem:[%s1548_s25 + $0x238] sm:$0xff]  ;;  %v458_v47 = vld [vmem:[%s1548_s25 + $0x240] sm:$0xff] }
  0x20   : > { %395 = vst [vmem:[%s1553_s26 + $0x78] sm:$0xff] %v394_v15  ;;  %v460_v48 = vld [vmem:[%s1548_s25 + $0x248] sm:$0xff]  ;;  %v462_v49 = vld [vmem:[%s1548_s25 + $0x250] sm:$0xff]  ;;  %v464_v50 = vld [vmem:[%s1548_s25 + $0x320] sm:$0xff] }
  0x21   : > { %397 = vst [vmem:[%s1553_s26 + $0x80] sm:$0xff] %v396_v16  ;;  %v466_v51 = vld [vmem:[%s1548_s25 + $0x328] sm:$0xff]  ;;  %v468_v52 = vld [vmem:[%s1548_s25 + $0x330] sm:$0xff]  ;;  %v470_v53 = vld [vmem:[%s1548_s25 + $0x338] sm:$0xff] }
  0x22   : > { %399 = vst [vmem:[%s1553_s26 + $0x88] sm:$0xff] %v398_v17  ;;  %v472_v54 = vld [vmem:[%s1548_s25 + $0x340] sm:$0xff]  ;;  %v474_v55 = vld [vmem:[%s1548_s25 + $0x348] sm:$0xff]  ;;  %v476_v56 = vld [vmem:[%s1548_s25 + $0x350] sm:$0xff] }
  0x23   : > { %401 = vst [vmem:[%s1553_s26 + $0x90] sm:$0xff] %v400_v18  ;;  %v478_v57 = vld [vmem:[%s1548_s25 + $0x358] sm:$0xff]  ;;  %v480_v58 = vld [vmem:[%s1548_s25 + $0x360] sm:$0xff]  ;;  %v482_v59 = vld [vmem:[%s1548_s25 + $0x368] sm:$0xff] }
  0x24   : > { %403 = vst [vmem:[%s1553_s26 + $0x98] sm:$0xff] %v402_v19  ;;  %v484_v60 = vld [vmem:[%s1548_s25 + $0x370] sm:$0xff]  ;;  %v486_v61 = vld [vmem:[%s1548_s25 + $0x378] sm:$0xff]  ;;  %v488_v62 = vld [vmem:[%s1548_s25 + $0x380] sm:$0xff] }
  0x25   : > { %405 = vst [vmem:[%s1553_s26 + $0xa0] sm:$0xff] %v404_v20  ;;  %v490_v63 = vld [vmem:[%s1548_s25 + $0x388] sm:$0xff]  ;;  %v492_v0 = vld [vmem:[%s1548_s25 + $0x390] sm:$0xff]  ;;  %v494_v1 = vld [vmem:[%s1548_s25 + $0x398] sm:$0xff] }
  0x26   : > { %407 = vst [vmem:[%s1553_s26 + $0xa8] sm:$0xff] %v406_v21  ;;  %v496_v2 = vld [vmem:[%s1548_s25 + $0x3a0] sm:$0xff]  ;;  %v498_v3 = vld [vmem:[%s1548_s25 + $0x3a8] sm:$0xff]  ;;  %v500_v4 = vld [vmem:[%s1548_s25 + $0x3b0] sm:$0xff] }
  0x27   : > { %409 = vst [vmem:[%s1553_s26 + $0xb0] sm:$0xff] %v408_v22  ;;  %v502_v5 = vld [vmem:[%s1548_s25 + $0x3b8] sm:$0xff]  ;;  %v504_v6 = vld [vmem:[%s1548_s25 + $0x3c0] sm:$0xff]  ;;  %v506_v7 = vld [vmem:[%s1548_s25 + $0x3c8] sm:$0xff] }
  0x28   : > { %411 = vst [vmem:[%s1553_s26 + $0xb8] sm:$0xff] %v410_v23  ;;  %v508_v8 = vld [vmem:[%s1548_s25 + $0x3d0] sm:$0xff]  ;;  %v510_v9 = vld [vmem:[%s1548_s25 + $0x3d8] sm:$0xff]  ;;  %v512_v10 = vld [vmem:[%s1548_s25 + $0x3e0] sm:$0xff] }
  0x29   : > { %413 = vst [vmem:[%s1553_s26 + $0xc0] sm:$0xff] %v412_v24  ;;  %v514_v11 = vld [vmem:[%s1548_s25 + $0x4b0] sm:$0xff]  ;;  %v516_v12 = vld [vmem:[%s1548_s25 + $0x4b8] sm:$0xff]  ;;  %v518_v13 = vld [vmem:[%s1548_s25 + $0x4c0] sm:$0xff] }
  0x2a   : > { %415 = vst [vmem:[%s1553_s26 + $0xc8] sm:$0xff] %v414_v25  ;;  %v520_v14 = vld [vmem:[%s1548_s25 + $0x4c8] sm:$0xff]  ;;  %v522_v15 = vld [vmem:[%s1548_s25 + $0x4d0] sm:$0xff]  ;;  %v524_v16 = vld [vmem:[%s1548_s25 + $0x4d8] sm:$0xff] }
  0x2b   : > { %417 = vst [vmem:[%s1553_s26 + $0xd0] sm:$0xff] %v416_v26  ;;  %v526_v17 = vld [vmem:[%s1548_s25 + $0x4e0] sm:$0xff]  ;;  %v528_v18 = vld [vmem:[%s1548_s25 + $0x4e8] sm:$0xff]  ;;  %v530_v19 = vld [vmem:[%s1548_s25 + $0x4f0] sm:$0xff] }
  0x2c   : > { %419 = vst [vmem:[%s1553_s26 + $0xd8] sm:$0xff] %v418_v27  ;;  %v532_v20 = vld [vmem:[%s1548_s25 + $0x4f8] sm:$0xff]  ;;  %v534_v21 = vld [vmem:[%s1548_s25 + $0x500] sm:$0xff]  ;;  %v536_v22 = vld [vmem:[%s1548_s25 + $0x508] sm:$0xff] }
  0x2d   : > { %421 = vst [vmem:[%s1553_s26 + $0xe0] sm:$0xff] %v420_v28  ;;  %v538_v23 = vld [vmem:[%s1548_s25 + $0x510] sm:$0xff]  ;;  %v540_v24 = vld [vmem:[%s1548_s25 + $0x518] sm:$0xff]  ;;  %v542_v25 = vld [vmem:[%s1548_s25 + $0x520] sm:$0xff] }
  0x2e   : > { %423 = vst [vmem:[%s1553_s26 + $0xe8] sm:$0xff] %v422_v29  ;;  %v544_v26 = vld [vmem:[%s1548_s25 + $0x528] sm:$0xff]  ;;  %v546_v27 = vld [vmem:[%s1548_s25 + $0x530] sm:$0xff]  ;;  %v548_v28 = vld [vmem:[%s1548_s25 + $0x538] sm:$0xff] }
  0x2f   : > { %425 = vst [vmem:[%s1553_s26 + $0xf0] sm:$0xff] %v424_v30  ;;  %v550_v29 = vld [vmem:[%s1548_s25 + $0x540] sm:$0xff]  ;;  %v552_v30 = vld [vmem:[%s1548_s25 + $0x548] sm:$0xff] }
  0x30   : > { %427 = vst [vmem:[%s1553_s26 + $0xf8] sm:$0xff] %v426_v31  ;;  %v554_v31 = vld [vmem:[%s1548_s25 + $0x550] sm:$0xff] }
  0x31   : > { %429 = vst [vmem:[%s1553_s26 + $0x100] sm:$0xff] %v428_v32  ;;  %v556_v32 = vld [vmem:[%s1548_s25 + $0x558] sm:$0xff] }
  0x32   : > { %431 = vst [vmem:[%s1553_s26 + $0x108] sm:$0xff] %v430_v33  ;;  %v558_v33 = vld [vmem:[%s1548_s25 + $0x560] sm:$0xff] }
  0x33   : > { %433 = vst [vmem:[%s1553_s26 + $0x110] sm:$0xff] %v432_v34  ;;  %v560_v34 = vld [vmem:[%s1548_s25 + $0x568] sm:$0xff] }
  0x34   : > { %435 = vst [vmem:[%s1553_s26 + $0x118] sm:$0xff] %v434_v35  ;;  %v562_v35 = vld [vmem:[%s1548_s25 + $0x570] sm:$0xff] }
  0x35   : > { %437 = vst [vmem:[%s1553_s26 + $0x120] sm:$0xff] %v436_v36 }
  0x36   : > { %439 = vst [vmem:[%s1553_s26 + $0x128] sm:$0xff] %v438_v37 }
  0x37   : > { %441 = vst [vmem:[%s1553_s26 + $0x130] sm:$0xff] %v440_v38 }
  0x38   : > { %443 = vst [vmem:[%s1553_s26 + $0x138] sm:$0xff] %v442_v39 }
  0x39   : > { %445 = vst [vmem:[%s1553_s26 + $0x140] sm:$0xff] %v444_v40 }
  0x3a   : > { %447 = vst [vmem:[%s1553_s26 + $0x148] sm:$0xff] %v446_v41 }
  0x3b   : > { %449 = vst [vmem:[%s1553_s26 + $0x150] sm:$0xff] %v448_v42 }
  0x3c   : > { %451 = vst [vmem:[%s1553_s26 + $0x158] sm:$0xff] %v450_v43 }
  0x3d   : > { %453 = vst [vmem:[%s1553_s26 + $0x160] sm:$0xff] %v452_v44 }
  0x3e   : > { %455 = vst [vmem:[%s1553_s26 + $0x168] sm:$0xff] %v454_v45 }
  0x3f   : > { %457 = vst [vmem:[%s1553_s26 + $0x170] sm:$0xff] %v456_v46 }
  0x40   : > { %459 = vst [vmem:[%s1553_s26 + $0x178] sm:$0xff] %v458_v47 }
  0x41   : > { %461 = vst [vmem:[%s1553_s26 + $0x180] sm:$0xff] %v460_v48 }
  0x42   : > { %463 = vst [vmem:[%s1553_s26 + $0x188] sm:$0xff] %v462_v49 }
  0x43   : > { %465 = vst [vmem:[%s1553_s26 + $0x190] sm:$0xff] %v464_v50 }
  0x44   : > { %467 = vst [vmem:[%s1553_s26 + $0x198] sm:$0xff] %v466_v51 }
  0x45   : > { %469 = vst [vmem:[%s1553_s26 + $0x1a0] sm:$0xff] %v468_v52 }
  0x46   : > { %471 = vst [vmem:[%s1553_s26 + $0x1a8] sm:$0xff] %v470_v53 }
  0x47   : > { %473 = vst [vmem:[%s1553_s26 + $0x1b0] sm:$0xff] %v472_v54 }
  0x48   : > { %475 = vst [vmem:[%s1553_s26 + $0x1b8] sm:$0xff] %v474_v55 }
  0x49   : > { %477 = vst [vmem:[%s1553_s26 + $0x1c0] sm:$0xff] %v476_v56 }
  0x4a   : > { %479 = vst [vmem:[%s1553_s26 + $0x1c8] sm:$0xff] %v478_v57 }
  0x4b   : > { %481 = vst [vmem:[%s1553_s26 + $0x1d0] sm:$0xff] %v480_v58 }
  0x4c   : > { %483 = vst [vmem:[%s1553_s26 + $0x1d8] sm:$0xff] %v482_v59 }
  0x4d   : > { %485 = vst [vmem:[%s1553_s26 + $0x1e0] sm:$0xff] %v484_v60 }
  0x4e   : > { %487 = vst [vmem:[%s1553_s26 + $0x1e8] sm:$0xff] %v486_v61 }
  0x4f   : > { %489 = vst [vmem:[%s1553_s26 + $0x1f0] sm:$0xff] %v488_v62 }
  0x50   : > { %491 = vst [vmem:[%s1553_s26 + $0x1f8] sm:$0xff] %v490_v63 }
  0x51   : > { %493 = vst [vmem:[%s1553_s26 + $0x200] sm:$0xff] %v492_v0 }
  0x52   : > { %495 = vst [vmem:[%s1553_s26 + $0x208] sm:$0xff] %v494_v1 }
  0x53   : > { %497 = vst [vmem:[%s1553_s26 + $0x210] sm:$0xff] %v496_v2 }
  0x54   : > { %499 = vst [vmem:[%s1553_s26 + $0x218] sm:$0xff] %v498_v3 }
  0x55   : > { %501 = vst [vmem:[%s1553_s26 + $0x220] sm:$0xff] %v500_v4 }
  0x56   : > { %503 = vst [vmem:[%s1553_s26 + $0x228] sm:$0xff] %v502_v5 }
  0x57   : > { %505 = vst [vmem:[%s1553_s26 + $0x230] sm:$0xff] %v504_v6 }
  0x58   : > { %507 = vst [vmem:[%s1553_s26 + $0x238] sm:$0xff] %v506_v7 }
  0x59   : > { %509 = vst [vmem:[%s1553_s26 + $0x240] sm:$0xff] %v508_v8 }
  0x5a   : > { %511 = vst [vmem:[%s1553_s26 + $0x248] sm:$0xff] %v510_v9 }
  0x5b   : > { %513 = vst [vmem:[%s1553_s26 + $0x250] sm:$0xff] %v512_v10 }
  0x5c   : > { %515 = vst [vmem:[%s1553_s26 + $0x258] sm:$0xff] %v514_v11 }
  0x5d   : > { %517 = vst [vmem:[%s1553_s26 + $0x260] sm:$0xff] %v516_v12 }
  0x5e   : > { %519 = vst [vmem:[%s1553_s26 + $0x268] sm:$0xff] %v518_v13 }
  0x5f   : > { %521 = vst [vmem:[%s1553_s26 + $0x270] sm:$0xff] %v520_v14 }
  0x60   : > { %523 = vst [vmem:[%s1553_s26 + $0x278] sm:$0xff] %v522_v15 }
  0x61   : > { %525 = vst [vmem:[%s1553_s26 + $0x280] sm:$0xff] %v524_v16 }
  0x62   : > { %527 = vst [vmem:[%s1553_s26 + $0x288] sm:$0xff] %v526_v17 }
  0x63   : > { %529 = vst [vmem:[%s1553_s26 + $0x290] sm:$0xff] %v528_v18 }
  0x64   : > { %531 = vst [vmem:[%s1553_s26 + $0x298] sm:$0xff] %v530_v19 }
  0x65   : > { %533 = vst [vmem:[%s1553_s26 + $0x2a0] sm:$0xff] %v532_v20 }
  0x66   : > { %535 = vst [vmem:[%s1553_s26 + $0x2a8] sm:$0xff] %v534_v21 }
  0x67   : > { %537 = vst [vmem:[%s1553_s26 + $0x2b0] sm:$0xff] %v536_v22 }
  0x68   : > { %539 = vst [vmem:[%s1553_s26 + $0x2b8] sm:$0xff] %v538_v23 }
  0x69   : > { %541 = vst [vmem:[%s1553_s26 + $0x2c0] sm:$0xff] %v540_v24 }
  0x6a   : > { %543 = vst [vmem:[%s1553_s26 + $0x2c8] sm:$0xff] %v542_v25 }
  0x6b   : > { %545 = vst [vmem:[%s1553_s26 + $0x2d0] sm:$0xff] %v544_v26 }
  0x6c   : > { %547 = vst [vmem:[%s1553_s26 + $0x2d8] sm:$0xff] %v546_v27 }
  0x6d   : > { %549 = vst [vmem:[%s1553_s26 + $0x2e0] sm:$0xff] %v548_v28 }
  0x6e   : > { %551 = vst [vmem:[%s1553_s26 + $0x2e8] sm:$0xff] %v550_v29 }
  0x6f   : > { %553 = vst [vmem:[%s1553_s26 + $0x2f0] sm:$0xff] %v552_v30 }
  0x70   : > { %555 = vst [vmem:[%s1553_s26 + $0x2f8] sm:$0xff] %v554_v31 }
  0x71   : > { %557 = vst [vmem:[%s1553_s26 + $0x300] sm:$0xff] %v556_v32 }
  0x72   : > { %559 = vst [vmem:[%s1553_s26 + $0x308] sm:$0xff] %v558_v33 }
  0x73   : > { %561 = vst [vmem:[%s1553_s26 + $0x310] sm:$0xff] %v560_v34 }
  0x74   : > { %563 = vst [vmem:[%s1553_s26 + $0x318] sm:$0xff] %v562_v35 }
  0x75 PF: > { %p1363_p5 = scmp.ge.s32.totalorder %s1492_s14, 1  ;;  %p568_p6 = scmp.lt.s32.totalorder %s1492_s14, 3 }
  0x77   : > { %p569_p7 = pnand %p1363_p5, %p568_p6 }
  0x78   : > { %s575_s28 = sand.u32 (!%p569_p7), 1, %s1484_s12   ;;  %s599_s18 = smul.u32 (!%p569_p7), 25, %s1358_s15 }
  0x79   : > { %572 = sbr.rel (%p569_p7) target bundleno = 491 (0x1eb), region = 66 }
  0x7a   : > { %s1444_s6 = smul.u32 (!%p569_p7), 800, %s575_s28  ;;  %p600_p8 = scmp.lt.s32.totalorder (!%p569_p7), %s599_s18, 49 }
  0x7c   : > { %s1803_s17 = scalar_lea.vmem (!%p569_p7), [#allocation2], %s1444_s6 }
  0x7e   : > { %v620_v36 = vld [vmem:[%s2053_s1 + $0x78] sm:$0xff]  ;;  %v619_v37 = vld [vmem:[%s2053_s1 + $0x70] sm:$0xff]  ;;  %v618_v38 = vld [vmem:[%s2053_s1 + $0x68] sm:$0xff]  ;;  %s2060_s18 = smov (!%p600_p8, %s599_s18), 49 }
  0x7f   : > { %961 = vmatpush.msra.mxu2 %v620_v36  ;;  %1129 = vmatpush.msra.mxu3 %v620_v36  ;;  %v617_v39 = vld [vmem:[%s2053_s1 + $0x60] sm:$0xff]  ;;  %v616_v40 = vld [vmem:[%s2053_s1 + $0x58] sm:$0xff]  ;;  %v615_v41 = vld [vmem:[%s2053_s1 + $0x50] sm:$0xff]  ;;  %s1364_s14 = sshll.u32 %s2060_s18, 3 }
  0x80   : > { %650 = vmatpush.msra.mxu0 %v620_v36  ;;  %793 = vmatpush.msra.mxu1 %v620_v36  ;;  %v614_v42 = vld [vmem:[%s2053_s1 + $0x48] sm:$0xff]  ;;  %v613_v43 = vld [vmem:[%s2053_s1 + $0x40] sm:$0xff]  ;;  %v612_v44 = vld [vmem:[%s2053_s1 + $0x38] sm:$0xff]  ;;  %s1893_s23 = scalar_lea.vmem %s2055_s3, %s1364_s14 }
  0x81   : > { %962 = vmatpush.msra.mxu2 %v619_v37  ;;  %1130 = vmatpush.msra.mxu3 %v619_v37  ;;  %v611_v45 = vld [vmem:[%s2053_s1 + $0x30] sm:$0xff]  ;;  %v610_v46 = vld [vmem:[%s2053_s1 + $0x28] sm:$0xff]  ;;  %v609_v47 = vld [vmem:[%s2053_s1 + $0x20] sm:$0xff] }
  0x82   : > { %651 = vmatpush.msra.mxu0 %v619_v37  ;;  %794 = vmatpush.msra.mxu1 %v619_v37  ;;  %v608_v48 = vld [vmem:[%s2053_s1 + $0x18] sm:$0xff]  ;;  %v607_v49 = vld [vmem:[%s2053_s1 + $0x10] sm:$0xff]  ;;  %v606_v50 = vld [vmem:[%s2053_s1 + $0x8] sm:$0xff] }
  0x83   : > { %963 = vmatpush.msra.mxu2 %v618_v38  ;;  %1131 = vmatpush.msra.mxu3 %v618_v38  ;;  %v605_v51 = vld [vmem:[%s2053_s1] sm:$0xff]  ;;  %v1390_v52 = vld [vmem:[%s1803_s17 + $0x190] sm:$0xff]  ;;  %v1415_v53 = vld [vmem:[%s1803_s17 + $0x258] sm:$0xff] }
  0x84   : > { %652 = vmatpush.msra.mxu0 %v618_v38  ;;  %795 = vmatpush.msra.mxu1 %v618_v38  ;;  %v622_v54 = vld [vmem:[%s1803_s17] sm:$0xff]  ;;  %v1365_v55 = vld [vmem:[%s1803_s17 + $0xc8] sm:$0xff]  ;;  %v1391_v56 = vld [vmem:[%s1803_s17 + $0x198] sm:$0xff] }
  0x85   : > { %964 = vmatpush.msra.mxu2 %v617_v39  ;;  %1132 = vmatpush.msra.mxu3 %v617_v39  ;;  %v1416_v57 = vld [vmem:[%s1803_s17 + $0x260] sm:$0xff]  ;;  %v623_v58 = vld [vmem:[%s1803_s17 + $0x8] sm:$0xff]  ;;  %v1366_v59 = vld [vmem:[%s1803_s17 + $0xd0] sm:$0xff] }
  0x86   : > { %653 = vmatpush.msra.mxu0 %v617_v39  ;;  %796 = vmatpush.msra.mxu1 %v617_v39  ;;  %v1392_v60 = vld [vmem:[%s1803_s17 + $0x1a0] sm:$0xff]  ;;  %v1417_v61 = vld [vmem:[%s1803_s17 + $0x268] sm:$0xff]  ;;  %v624_v62 = vld [vmem:[%s1803_s17 + $0x10] sm:$0xff] }
  0x87   : > { %965 = vmatpush.msra.mxu2 %v616_v40  ;;  %1133 = vmatpush.msra.mxu3 %v616_v40  ;;  %v1367_v63 = vld [vmem:[%s1803_s17 + $0xd8] sm:$0xff]  ;;  %v1393_v0 = vld [vmem:[%s1803_s17 + $0x1a8] sm:$0xff]  ;;  %v1418_v1 = vld [vmem:[%s1803_s17 + $0x270] sm:$0xff] }
  0x88   : > { %654 = vmatpush.msra.mxu0 %v616_v40  ;;  %797 = vmatpush.msra.mxu1 %v616_v40  ;;  %v625_v2 = vld [vmem:[%s1803_s17 + $0x18] sm:$0xff]  ;;  %v1368_v3 = vld [vmem:[%s1803_s17 + $0xe0] sm:$0xff]  ;;  %v1394_v4 = vld [vmem:[%s1803_s17 + $0x1b0] sm:$0xff] }
  0x89   : > { %966 = vmatpush.msra.mxu2 %v615_v41  ;;  %1134 = vmatpush.msra.mxu3 %v615_v41  ;;  %v1419_v5 = vld [vmem:[%s1803_s17 + $0x278] sm:$0xff]  ;;  %v626_v6 = vld [vmem:[%s1803_s17 + $0x20] sm:$0xff]  ;;  %v1369_v7 = vld [vmem:[%s1803_s17 + $0xe8] sm:$0xff] }
  0x8a   : > { %655 = vmatpush.msra.mxu0 %v615_v41  ;;  %798 = vmatpush.msra.mxu1 %v615_v41  ;;  %v1395_v8 = vld [vmem:[%s1803_s17 + $0x1b8] sm:$0xff]  ;;  %v1420_v9 = vld [vmem:[%s1803_s17 + $0x280] sm:$0xff]  ;;  %v627_v10 = vld [vmem:[%s1803_s17 + $0x28] sm:$0xff] }
  0x8b   : > { %967 = vmatpush.msra.mxu2 %v614_v42  ;;  %1135 = vmatpush.msra.mxu3 %v614_v42  ;;  %v1370_v11 = vld [vmem:[%s1803_s17 + $0xf0] sm:$0xff]  ;;  %v1396_v12 = vld [vmem:[%s1803_s17 + $0x1c0] sm:$0xff]  ;;  %v1421_v13 = vld [vmem:[%s1803_s17 + $0x288] sm:$0xff] }
  0x8c   : > { %656 = vmatpush.msra.mxu0 %v614_v42  ;;  %799 = vmatpush.msra.mxu1 %v614_v42  ;;  %v628_v14 = vld [vmem:[%s1803_s17 + $0x30] sm:$0xff]  ;;  %v1371_v15 = vld [vmem:[%s1803_s17 + $0xf8] sm:$0xff]  ;;  %v1397_v16 = vld [vmem:[%s1803_s17 + $0x1c8] sm:$0xff] }
  0x8d   : > { %968 = vmatpush.msra.mxu2 %v613_v43  ;;  %1136 = vmatpush.msra.mxu3 %v613_v43  ;;  %v1422_v17 = vld [vmem:[%s1803_s17 + $0x290] sm:$0xff]  ;;  %v629_v18 = vld [vmem:[%s1803_s17 + $0x38] sm:$0xff]  ;;  %v1372_v19 = vld [vmem:[%s1803_s17 + $0x100] sm:$0xff] }
  0x8e   : > { %657 = vmatpush.msra.mxu0 %v613_v43  ;;  %800 = vmatpush.msra.mxu1 %v613_v43  ;;  %v1398_v20 = vld [vmem:[%s1803_s17 + $0x1d0] sm:$0xff]  ;;  %v1423_v21 = vld [vmem:[%s1803_s17 + $0x298] sm:$0xff]  ;;  %v630_v22 = vld [vmem:[%s1803_s17 + $0x40] sm:$0xff] }
  0x8f   : > { %969 = vmatpush.msra.mxu2 %v612_v44  ;;  %1137 = vmatpush.msra.mxu3 %v612_v44  ;;  %v1373_v23 = vld [vmem:[%s1803_s17 + $0x108] sm:$0xff]  ;;  %v1399_v24 = vld [vmem:[%s1803_s17 + $0x1d8] sm:$0xff]  ;;  %v1424_v25 = vld [vmem:[%s1803_s17 + $0x2a0] sm:$0xff] }
  0x90   : > { %658 = vmatpush.msra.mxu0 %v612_v44  ;;  %801 = vmatpush.msra.mxu1 %v612_v44  ;;  %v631_v26 = vld [vmem:[%s1803_s17 + $0x48] sm:$0xff]  ;;  %v1374_v27 = vld [vmem:[%s1803_s17 + $0x110] sm:$0xff]  ;;  %v1400_v28 = vld [vmem:[%s1803_s17 + $0x1e0] sm:$0xff] }
  0x91   : > { %970 = vmatpush.msra.mxu2 %v611_v45  ;;  %1138 = vmatpush.msra.mxu3 %v611_v45  ;;  %v1425_v29 = vld [vmem:[%s1803_s17 + $0x2a8] sm:$0xff]  ;;  %v632_v30 = vld [vmem:[%s1803_s17 + $0x50] sm:$0xff]  ;;  %v1375_v31 = vld [vmem:[%s1803_s17 + $0x118] sm:$0xff] }
  0x92   : > { %659 = vmatpush.msra.mxu0 %v611_v45  ;;  %802 = vmatpush.msra.mxu1 %v611_v45  ;;  %v1401_v32 = vld [vmem:[%s1803_s17 + $0x1e8] sm:$0xff]  ;;  %v1426_v33 = vld [vmem:[%s1803_s17 + $0x2b0] sm:$0xff]  ;;  %v633_v34 = vld [vmem:[%s1803_s17 + $0x58] sm:$0xff] }
  0x93   : > { %971 = vmatpush.msra.mxu2 %v610_v46  ;;  %1139 = vmatpush.msra.mxu3 %v610_v46  ;;  %v1376_v35 = vld [vmem:[%s1803_s17 + $0x120] sm:$0xff]  ;;  %v1402_v36 = vld [vmem:[%s1803_s17 + $0x1f0] sm:$0xff]  ;;  %v1427_v37 = vld [vmem:[%s1803_s17 + $0x2b8] sm:$0xff] }
  0x94   : > { %660 = vmatpush.msra.mxu0 %v610_v46  ;;  %803 = vmatpush.msra.mxu1 %v610_v46  ;;  %v634_v38 = vld [vmem:[%s1803_s17 + $0x60] sm:$0xff]  ;;  %v1377_v39 = vld [vmem:[%s1803_s17 + $0x128] sm:$0xff]  ;;  %v1403_v40 = vld [vmem:[%s1803_s17 + $0x1f8] sm:$0xff] }
  0x95   : > { %972 = vmatpush.msra.mxu2 %v609_v47  ;;  %1140 = vmatpush.msra.mxu3 %v609_v47  ;;  %v1428_v41 = vld [vmem:[%s1803_s17 + $0x2c0] sm:$0xff]  ;;  %v635_v42 = vld [vmem:[%s1803_s17 + $0x68] sm:$0xff]  ;;  %v1378_v43 = vld [vmem:[%s1803_s17 + $0x130] sm:$0xff] }
  0x96   : > { %661 = vmatpush.msra.mxu0 %v609_v47  ;;  %804 = vmatpush.msra.mxu1 %v609_v47  ;;  %v1404_v44 = vld [vmem:[%s1803_s17 + $0x200] sm:$0xff]  ;;  %v1429_v45 = vld [vmem:[%s1803_s17 + $0x2c8] sm:$0xff]  ;;  %v636_v46 = vld [vmem:[%s1803_s17 + $0x70] sm:$0xff] }
  0x97   : > { %973 = vmatpush.msra.mxu2 %v608_v48  ;;  %1141 = vmatpush.msra.mxu3 %v608_v48  ;;  %v1379_v47 = vld [vmem:[%s1803_s17 + $0x138] sm:$0xff] }
  0x98   : > { %662 = vmatpush.msra.mxu0 %v608_v48  ;;  %805 = vmatpush.msra.mxu1 %v608_v48  ;;  %v1405_v48 = vld [vmem:[%s1803_s17 + $0x208] sm:$0xff] }
  0x99   : > { %974 = vmatpush.msra.mxu2 %v607_v49  ;;  %1142 = vmatpush.msra.mxu3 %v607_v49 }
  0x9a   : > { %663 = vmatpush.msra.mxu0 %v607_v49  ;;  %806 = vmatpush.msra.mxu1 %v607_v49  ;;  %v1430_v49 = vld [vmem:[%s1803_s17 + $0x2d0] sm:$0xff] }
  0x9b   : > { %975 = vmatpush.msra.mxu2 %v606_v50  ;;  %1143 = vmatpush.msra.mxu3 %v606_v50 }
  0x9c   : > { %664 = vmatpush.msra.mxu0 %v606_v50  ;;  %807 = vmatpush.msra.mxu1 %v606_v50  ;;  %v637_v50 = vld [vmem:[%s1803_s17 + $0x78] sm:$0xff] }
  0x9d   : > { %976 = vmatpush.msra.mxu2 %v605_v51  ;;  %1144 = vmatpush.msra.mxu3 %v605_v51 }
  0x9e   : > { %977 = vmatmul.f32.vlgmr.msra.gmra.mxu2 %v1390_v52  ;;  %1145 = vmatmul.f32.vlgmr.msra.gmra.mxu3 %v1415_v53  ;;  %v1874_v52 = vld [vmem:[%s2054_s2] ss:$0 sm:$0xff]  ;;  %v1406_v53 = vld [vmem:[%s1803_s17 + $0x210] sm:$0xff] }
  0x9f   : > { %665 = vmatpush.msra.mxu0 %v605_v51  ;;  %808 = vmatpush.msra.mxu1 %v605_v51  ;;  %v1380_v51 = vld [vmem:[%s1803_s17 + $0x140] sm:$0xff] }
  0xa0   : > { %666 = vmatmul.f32.vlgmr.msra.gmra.mxu0 %v622_v54  ;;  %809 = vmatmul.f32.vlgmr.msra.gmra.mxu1 %v1365_v55  ;;  %v1431_v54 = vld [vmem:[%s1803_s17 + $0x2d8] sm:$0xff] }
  0xa6   : > { %980 = vmatmul.f32.gmra.mxu2 %v1391_v56  ;;  %1148 = vmatmul.f32.gmra.mxu3 %v1416_v57  ;;  %v638_v57 = vld [vmem:[%s1803_s17 + $0x80] sm:$0xff] }
  0xa8   : > { %669 = vmatmul.f32.gmra.mxu0 %v623_v58  ;;  %812 = vmatmul.f32.gmra.mxu1 %v1366_v59  ;;  %v1381_v58 = vld [vmem:[%s1803_s17 + $0x148] sm:$0xff] }
  0xae   : > { %983 = vmatmul.f32.gmra.mxu2 %v1392_v60  ;;  %1151 = vmatmul.f32.gmra.mxu3 %v1417_v61 }
  0xb0   : > { %672 = vmatmul.f32.gmra.mxu0 %v624_v62  ;;  %815 = vmatmul.f32.gmra.mxu1 %v1367_v63 }
  0xb6   : > { %986 = vmatmul.f32.gmra.mxu2 %v1393_v0  ;;  %1154 = vmatmul.f32.gmra.mxu3 %v1418_v1 }
  0xb8   : > { %675 = vmatmul.f32.gmra.mxu0 %v625_v2  ;;  %818 = vmatmul.f32.gmra.mxu1 %v1368_v3 }
  0xbe   : > { %989 = vmatmul.f32.gmra.mxu2 %v1394_v4  ;;  %1157 = vmatmul.f32.gmra.mxu3 %v1419_v5  ;;  %v1407_v4 = vld [vmem:[%s1803_s17 + $0x218] sm:$0xff]  ;;  %v1432_v5 = vld [vmem:[%s1803_s17 + $0x2e0] sm:$0xff] }
  0xc0   : > { %678 = vmatmul.f32.gmra.mxu0 %v626_v6  ;;  %821 = vmatmul.f32.gmra.mxu1 %v1369_v7 }
  0xc6   : > { %992 = vmatmul.f32.gmra.mxu2 %v1395_v8  ;;  %1160 = vmatmul.f32.gmra.mxu3 %v1420_v9 }
  0xc8   : > { %681 = vmatmul.f32.gmra.mxu0 %v627_v10  ;;  %824 = vmatmul.f32.gmra.mxu1 %v1370_v11  ;;  %v639_v10 = vld [vmem:[%s1803_s17 + $0x88] sm:$0xff]  ;;  %v1382_v11 = vld [vmem:[%s1803_s17 + $0x150] sm:$0xff] }
  0xce   : > { %995 = vmatmul.f32.gmra.mxu2 %v1396_v12  ;;  %1163 = vmatmul.f32.gmra.mxu3 %v1421_v13 }
  0xd0   : > { %684 = vmatmul.f32.gmra.mxu0 %v628_v14  ;;  %827 = vmatmul.f32.gmra.mxu1 %v1371_v15 }
  0xd6   : > { %998 = vmatmul.f32.gmra.mxu2 %v1397_v16  ;;  %1166 = vmatmul.f32.gmra.mxu3 %v1422_v17 }
  0xd8   : > { %687 = vmatmul.f32.gmra.mxu0 %v629_v18  ;;  %830 = vmatmul.f32.gmra.mxu1 %v1372_v19 }
  0xde   : > { %1001 = vmatmul.f32.gmra.mxu2 %v1398_v20  ;;  %1169 = vmatmul.f32.gmra.mxu3 %v1423_v21 }
  0xe0   : > { %690 = vmatmul.f32.gmra.mxu0 %v630_v22  ;;  %833 = vmatmul.f32.gmra.mxu1 %v1373_v23  ;;  %v1408_v23 = vld [vmem:[%s1803_s17 + $0x220] sm:$0xff] }
  0xe6   : > { %1004 = vmatmul.f32.gmra.mxu2 %v1399_v24  ;;  %1172 = vmatmul.f32.gmra.mxu3 %v1424_v25  ;;  %v1433_v24 = vld [vmem:[%s1803_s17 + $0x2e8] sm:$0xff] }
  0xe8   : > { %693 = vmatmul.f32.gmra.mxu0 %v631_v26  ;;  %836 = vmatmul.f32.gmra.mxu1 %v1374_v27 }
  0xee   : > { %1007 = vmatmul.f32.gmra.mxu2 %v1400_v28  ;;  %1175 = vmatmul.f32.gmra.mxu3 %v1425_v29  ;;  %v640_v29 = vld [vmem:[%s1803_s17 + $0x90] sm:$0xff] }
  0xf0   : > { %696 = vmatmul.f32.gmra.mxu0 %v632_v30  ;;  %839 = vmatmul.f32.gmra.mxu1 %v1375_v31  ;;  %v1383_v30 = vld [vmem:[%s1803_s17 + $0x158] sm:$0xff] }
  0xf6   : > { %1010 = vmatmul.f32.gmra.mxu2 %v1401_v32  ;;  %1178 = vmatmul.f32.gmra.mxu3 %v1426_v33 }
  0xf8   : > { %699 = vmatmul.f32.gmra.mxu0 %v633_v34  ;;  %842 = vmatmul.f32.gmra.mxu1 %v1376_v35 }
  0xfe   : > { %1013 = vmatmul.f32.gmra.mxu2 %v1402_v36  ;;  %1181 = vmatmul.f32.gmra.mxu3 %v1427_v37 }
 0x100   : > { %702 = vmatmul.f32.gmra.mxu0 %v634_v38  ;;  %845 = vmatmul.f32.gmra.mxu1 %v1377_v39 }
 0x106   : > { %1016 = vmatmul.f32.gmra.mxu2 %v1403_v40  ;;  %1184 = vmatmul.f32.gmra.mxu3 %v1428_v41 }
 0x108   : > { %705 = vmatmul.f32.gmra.mxu0 %v635_v42  ;;  %848 = vmatmul.f32.gmra.mxu1 %v1378_v43  ;;  %v1409_v42 = vld [vmem:[%s1803_s17 + $0x228] sm:$0xff]  ;;  %v1434_v43 = vld [vmem:[%s1803_s17 + $0x2f0] sm:$0xff] }
 0x10e   : > { %1019 = vmatmul.f32.gmra.mxu2 %v1404_v44  ;;  %1187 = vmatmul.f32.gmra.mxu3 %v1429_v45 }
 0x110   : > { %708 = vmatmul.f32.gmra.mxu0 %v636_v46  ;;  %851 = vmatmul.f32.gmra.mxu1 %v1379_v47 }
 0x116   : > { %1022 = vmatmul.f32.gmra.mxu2 %v1405_v48  ;;  %1190 = vmatmul.f32.gmra.mxu3 %v1430_v49  ;;  %v641_v48 = vld [vmem:[%s1803_s17 + $0x98] sm:$0xff]  ;;  %v1384_v49 = vld [vmem:[%s1803_s17 + $0x160] sm:$0xff] }
 0x118   : > { %711 = vmatmul.f32.gmra.mxu0 %v637_v50  ;;  %854 = vmatmul.f32.gmra.mxu1 %v1380_v51 }
 0x11d   : > { %v667_v55 = vpop.f32.mrf.mxu0  ;;  %v810_v56 = vpop.f32.mrf.mxu1 }
 0x11e   : > { %1025 = vmatmul.f32.gmra.mxu2 %v1406_v53  ;;  %v668_v59 = vadd.f32 %v1874_v52, %v667_v55  ;;  %v811_v60 = vadd.f32 %v1874_v52, %v810_v56  ;;  %1193 = vmatmul.f32.gmra.mxu3 %v1431_v54 }
 0x120   : > { %v742_v61 = vmax.f32 %v668_v59, 0.0  ;;  %v885_v62 = vmax.f32 %v811_v60, 0.0  ;;  %714 = vmatmul.f32.gmra.mxu0 %v638_v57  ;;  %857 = vmatmul.f32.gmra.mxu1 %v1381_v58 }
 0x121   : > { %v978_v63 = vpop.f32.mrf.mxu2  ;;  %v1146_v0 = vpop.f32.mrf.mxu3 }
 0x122   : > { %v910_v1 = vmax.f32 %v742_v61, %v885_v62  ;;  %v979_v2 = vadd.f32 %v1874_v52, %v978_v63  ;;  %v1147_v3 = vadd.f32 %v1874_v52, %v1146_v0  ;;  %v1410_v62 = vld [vmem:[%s1803_s17 + $0x230] sm:$0xff]  ;;  %v1435_v63 = vld [vmem:[%s1803_s17 + $0x2f8] sm:$0xff] }
 0x124   : > { %v1053_v6 = vmax.f32 %v979_v2, 0.0  ;;  %v1221_v7 = vmax.f32 %v1147_v3, 0.0 }
 0x125   : > { %v670_v8 = vpop.f32.mrf.mxu0  ;;  %v813_v9 = vpop.f32.mrf.mxu1 }
 0x126   : > { %v1078_v12 = vmax.f32 %v910_v1, %v1053_v6  ;;  %1028 = vmatmul.f32.gmra.mxu2 %v1407_v4  ;;  %v671_v13 = vadd.f32 %v1874_v52, %v670_v8  ;;  %v814_v14 = vadd.f32 %v1874_v52, %v813_v9  ;;  %1196 = vmatmul.f32.gmra.mxu3 %v1432_v5  ;;  %v642_v4 = vld [vmem:[%s1803_s17 + $0xa0] sm:$0xff]  ;;  %v1385_v5 = vld [vmem:[%s1803_s17 + $0x168] sm:$0xff] }
 0x128   : > { %v1246_v15 = vmax.f32 %v1078_v12, %v1221_v7  ;;  %v743_v16 = vmax.f32 %v671_v13, 0.0  ;;  %v886_v17 = vmax.f32 %v814_v14, 0.0  ;;  %717 = vmatmul.f32.gmra.mxu0 %v639_v10  ;;  %860 = vmatmul.f32.gmra.mxu1 %v1382_v11 }
 0x129   : > { %v981_v18 = vpop.f32.mrf.mxu2  ;;  %v1149_v19 = vpop.f32.mrf.mxu3 }
 0x12a   : > { %1271 = vst [vmem:[%s1893_s23] sm:$0xff] %v1246_v15  ;;  %v911_v20 = vmax.f32 %v743_v16, %v886_v17  ;;  %v982_v21 = vadd.f32 %v1874_v52, %v981_v18  ;;  %v1150_v22 = vadd.f32 %v1874_v52, %v1149_v19  ;;  %v1411_v17 = vld [vmem:[%s1803_s17 + $0x238] sm:$0xff]  ;;  %v1436_v18 = vld [vmem:[%s1803_s17 + $0x300] sm:$0xff] }
 0x12c   : > { %v1054_v25 = vmax.f32 %v982_v21, 0.0  ;;  %v1222_v26 = vmax.f32 %v1150_v22, 0.0 }
 0x12d   : > { %v673_v27 = vpop.f32.mrf.mxu0  ;;  %v816_v28 = vpop.f32.mrf.mxu1 }
 0x12e   : > { %v1079_v31 = vmax.f32 %v911_v20, %v1054_v25  ;;  %1031 = vmatmul.f32.gmra.mxu2 %v1408_v23  ;;  %v674_v32 = vadd.f32 %v1874_v52, %v673_v27  ;;  %v817_v33 = vadd.f32 %v1874_v52, %v816_v28  ;;  %1199 = vmatmul.f32.gmra.mxu3 %v1433_v24  ;;  %v643_v23 = vld [vmem:[%s1803_s17 + $0xa8] sm:$0xff]  ;;  %v1386_v24 = vld [vmem:[%s1803_s17 + $0x170] sm:$0xff] }
 0x130   : > { %v1247_v34 = vmax.f32 %v1079_v31, %v1222_v26  ;;  %v744_v35 = vmax.f32 %v674_v32, 0.0  ;;  %v887_v36 = vmax.f32 %v817_v33, 0.0  ;;  %720 = vmatmul.f32.gmra.mxu0 %v640_v29  ;;  %863 = vmatmul.f32.gmra.mxu1 %v1383_v30 }
 0x131   : > { %v984_v37 = vpop.f32.mrf.mxu2  ;;  %v1152_v38 = vpop.f32.mrf.mxu3 }
 0x132   : > { %1272 = vst [vmem:[%s1893_s23 + $0x8] sm:$0xff] %v1247_v34  ;;  %v912_v39 = vmax.f32 %v744_v35, %v887_v36  ;;  %v985_v40 = vadd.f32 %v1874_v52, %v984_v37  ;;  %v1153_v41 = vadd.f32 %v1874_v52, %v1152_v38  ;;  %v1412_v36 = vld [vmem:[%s1803_s17 + $0x240] sm:$0xff]  ;;  %v1437_v37 = vld [vmem:[%s1803_s17 + $0x308] sm:$0xff] }
 0x134   : > { %v1055_v44 = vmax.f32 %v985_v40, 0.0  ;;  %v1223_v45 = vmax.f32 %v1153_v41, 0.0 }
 0x135   : > { %v676_v46 = vpop.f32.mrf.mxu0  ;;  %v819_v47 = vpop.f32.mrf.mxu1 }
 0x136   : > { %v1080_v50 = vmax.f32 %v912_v39, %v1055_v44  ;;  %1034 = vmatmul.f32.gmra.mxu2 %v1409_v42  ;;  %v677_v51 = vadd.f32 %v1874_v52, %v676_v46  ;;  %v820_v53 = vadd.f32 %v1874_v52, %v819_v47  ;;  %1202 = vmatmul.f32.gmra.mxu3 %v1434_v43  ;;  %v644_v42 = vld [vmem:[%s1803_s17 + $0xb0] sm:$0xff]  ;;  %v1387_v43 = vld [vmem:[%s1803_s17 + $0x178] sm:$0xff] }
 0x138   : > { %v1248_v54 = vmax.f32 %v1080_v50, %v1223_v45  ;;  %v745_v55 = vmax.f32 %v677_v51, 0.0  ;;  %v888_v56 = vmax.f32 %v820_v53, 0.0  ;;  %723 = vmatmul.f32.gmra.mxu0 %v641_v48  ;;  %866 = vmatmul.f32.gmra.mxu1 %v1384_v49 }
 0x139   : > { %v987_v57 = vpop.f32.mrf.mxu2  ;;  %v1155_v58 = vpop.f32.mrf.mxu3 }
 0x13a   : > { %1273 = vst [vmem:[%s1893_s23 + $0x10] sm:$0xff] %v1248_v54  ;;  %v913_v59 = vmax.f32 %v745_v55, %v888_v56  ;;  %v988_v60 = vadd.f32 %v1874_v52, %v987_v57  ;;  %v1156_v61 = vadd.f32 %v1874_v52, %v1155_v58  ;;  %v1413_v56 = vld [vmem:[%s1803_s17 + $0x248] sm:$0xff]  ;;  %v1438_v57 = vld [vmem:[%s1803_s17 + $0x310] sm:$0xff] }
 0x13c   : > { %v1056_v0 = vmax.f32 %v988_v60, 0.0  ;;  %v1224_v1 = vmax.f32 %v1156_v61, 0.0 }
 0x13d   : > { %v679_v2 = vpop.f32.mrf.mxu0  ;;  %v822_v3 = vpop.f32.mrf.mxu1 }
 0x13e   : > { %v1081_v6 = vmax.f32 %v913_v59, %v1056_v0  ;;  %1037 = vmatmul.f32.gmra.mxu2 %v1410_v62  ;;  %v680_v7 = vadd.f32 %v1874_v52, %v679_v2  ;;  %v823_v8 = vadd.f32 %v1874_v52, %v822_v3  ;;  %1205 = vmatmul.f32.gmra.mxu3 %v1435_v63  ;;  %v645_v62 = vld [vmem:[%s1803_s17 + $0xb8] sm:$0xff]  ;;  %v1388_v63 = vld [vmem:[%s1803_s17 + $0x180] sm:$0xff] }
 0x140   : > { %v1249_v9 = vmax.f32 %v1081_v6, %v1224_v1  ;;  %v746_v10 = vmax.f32 %v680_v7, 0.0  ;;  %v889_v11 = vmax.f32 %v823_v8, 0.0  ;;  %726 = vmatmul.f32.gmra.mxu0 %v642_v4  ;;  %869 = vmatmul.f32.gmra.mxu1 %v1385_v5 }
 0x141   : > { %v990_v12 = vpop.f32.mrf.mxu2  ;;  %v1158_v13 = vpop.f32.mrf.mxu3 }
 0x142   : > { %1274 = vst [vmem:[%s1893_s23 + $0x18] sm:$0xff] %v1249_v9  ;;  %v914_v14 = vmax.f32 %v746_v10, %v889_v11  ;;  %v991_v15 = vadd.f32 %v1874_v52, %v990_v12  ;;  %v1159_v16 = vadd.f32 %v1874_v52, %v1158_v13  ;;  %v1414_v11 = vld [vmem:[%s1803_s17 + $0x250] sm:$0xff]  ;;  %v1439_v12 = vld [vmem:[%s1803_s17 + $0x318] sm:$0xff] }
 0x144   : > { %v1057_v19 = vmax.f32 %v991_v15, 0.0  ;;  %v1225_v20 = vmax.f32 %v1159_v16, 0.0 }
 0x145   : > { %v682_v21 = vpop.f32.mrf.mxu0  ;;  %v825_v22 = vpop.f32.mrf.mxu1 }
 0x146   : > { %v1082_v25 = vmax.f32 %v914_v14, %v1057_v19  ;;  %1040 = vmatmul.f32.gmra.mxu2 %v1411_v17  ;;  %v683_v26 = vadd.f32 %v1874_v52, %v682_v21  ;;  %v826_v27 = vadd.f32 %v1874_v52, %v825_v22  ;;  %1208 = vmatmul.f32.gmra.mxu3 %v1436_v18  ;;  %v646_v17 = vld [vmem:[%s1803_s17 + $0xc0] sm:$0xff]  ;;  %v1389_v18 = vld [vmem:[%s1803_s17 + $0x188] sm:$0xff] }
 0x148   : > { %v1250_v28 = vmax.f32 %v1082_v25, %v1225_v20  ;;  %v747_v29 = vmax.f32 %v683_v26, 0.0  ;;  %v890_v30 = vmax.f32 %v826_v27, 0.0  ;;  %729 = vmatmul.f32.gmra.mxu0 %v643_v23  ;;  %872 = vmatmul.f32.gmra.mxu1 %v1386_v24 }
 0x149   : > { %v993_v31 = vpop.f32.mrf.mxu2  ;;  %v1161_v32 = vpop.f32.mrf.mxu3 }
 0x14a   : > { %1275 = vst [vmem:[%s1893_s23 + $0x20] sm:$0xff] %v1250_v28  ;;  %v915_v33 = vmax.f32 %v747_v29, %v890_v30  ;;  %v994_v34 = vadd.f32 %v1874_v52, %v993_v31  ;;  %v1162_v35 = vadd.f32 %v1874_v52, %v1161_v32 }
 0x14c   : > { %v1058_v38 = vmax.f32 %v994_v34, 0.0  ;;  %v1226_v39 = vmax.f32 %v1162_v35, 0.0 }
 0x14d   : > { %v685_v40 = vpop.f32.mrf.mxu0  ;;  %v828_v41 = vpop.f32.mrf.mxu1 }
 0x14e   : > { %v1083_v44 = vmax.f32 %v915_v33, %v1058_v38  ;;  %1043 = vmatmul.f32.gmra.mxu2 %v1412_v36  ;;  %v686_v45 = vadd.f32 %v1874_v52, %v685_v40  ;;  %v829_v46 = vadd.f32 %v1874_v52, %v828_v41  ;;  %1211 = vmatmul.f32.gmra.mxu3 %v1437_v37 }
 0x150   : > { %v1251_v47 = vmax.f32 %v1083_v44, %v1226_v39  ;;  %v748_v48 = vmax.f32 %v686_v45, 0.0  ;;  %v891_v49 = vmax.f32 %v829_v46, 0.0  ;;  %732 = vmatmul.f32.gmra.mxu0 %v644_v42  ;;  %875 = vmatmul.f32.gmra.mxu1 %v1387_v43 }
 0x151   : > { %v996_v50 = vpop.f32.mrf.mxu2  ;;  %v1164_v51 = vpop.f32.mrf.mxu3 }
 0x152   : > { %1276 = vst [vmem:[%s1893_s23 + $0x28] sm:$0xff] %v1251_v47  ;;  %v916_v53 = vmax.f32 %v748_v48, %v891_v49  ;;  %v997_v54 = vadd.f32 %v1874_v52, %v996_v50  ;;  %v1165_v55 = vadd.f32 %v1874_v52, %v1164_v51 }
 0x154   : > { %v1059_v58 = vmax.f32 %v997_v54, 0.0  ;;  %v1227_v59 = vmax.f32 %v1165_v55, 0.0 }
 0x155   : > { %v688_v60 = vpop.f32.mrf.mxu0  ;;  %v831_v61 = vpop.f32.mrf.mxu1 }
 0x156   : > { %v1084_v0 = vmax.f32 %v916_v53, %v1059_v58  ;;  %1046 = vmatmul.f32.gmra.mxu2 %v1413_v56  ;;  %v689_v1 = vadd.f32 %v1874_v52, %v688_v60  ;;  %v832_v2 = vadd.f32 %v1874_v52, %v831_v61  ;;  %1214 = vmatmul.f32.gmra.mxu3 %v1438_v57 }
 0x158   : > { %v1252_v3 = vmax.f32 %v1084_v0, %v1227_v59  ;;  %v749_v4 = vmax.f32 %v689_v1, 0.0  ;;  %v892_v5 = vmax.f32 %v832_v2, 0.0  ;;  %735 = vmatmul.f32.gmra.mxu0 %v645_v62  ;;  %878 = vmatmul.f32.gmra.mxu1 %v1388_v63 }
 0x159   : > { %v999_v6 = vpop.f32.mrf.mxu2  ;;  %v1167_v7 = vpop.f32.mrf.mxu3 }
 0x15a   : > { %1277 = vst [vmem:[%s1893_s23 + $0x30] sm:$0xff] %v1252_v3  ;;  %v917_v8 = vmax.f32 %v749_v4, %v892_v5  ;;  %v1000_v9 = vadd.f32 %v1874_v52, %v999_v6  ;;  %v1168_v10 = vadd.f32 %v1874_v52, %v1167_v7 }
 0x15c   : > { %v1060_v13 = vmax.f32 %v1000_v9, 0.0  ;;  %v1228_v14 = vmax.f32 %v1168_v10, 0.0 }
 0x15d   : > { %v691_v15 = vpop.f32.mrf.mxu0  ;;  %v834_v16 = vpop.f32.mrf.mxu1 }
 0x15e   : > { %v1085_v19 = vmax.f32 %v917_v8, %v1060_v13  ;;  %1049 = vmatmul.f32.gmra.mxu2 %v1414_v11  ;;  %v692_v20 = vadd.f32 %v1874_v52, %v691_v15  ;;  %v835_v21 = vadd.f32 %v1874_v52, %v834_v16  ;;  %1217 = vmatmul.f32.gmra.mxu3 %v1439_v12 }
 0x160   : > { %v1253_v22 = vmax.f32 %v1085_v19, %v1228_v14  ;;  %v750_v23 = vmax.f32 %v692_v20, 0.0  ;;  %v893_v24 = vmax.f32 %v835_v21, 0.0  ;;  %738 = vmatmul.f32.gmra.mxu0 %v646_v17  ;;  %881 = vmatmul.f32.gmra.mxu1 %v1389_v18 }
 0x161   : > { %v1002_v25 = vpop.f32.mrf.mxu2  ;;  %v1170_v26 = vpop.f32.mrf.mxu3 }
 0x162   : > { %1278 = vst [vmem:[%s1893_s23 + $0x38] sm:$0xff] %v1253_v22  ;;  %v918_v27 = vmax.f32 %v750_v23, %v893_v24  ;;  %v1003_v28 = vadd.f32 %v1874_v52, %v1002_v25  ;;  %v1171_v29 = vadd.f32 %v1874_v52, %v1170_v26 }
 0x164   : > { %v1061_v30 = vmax.f32 %v1003_v28, 0.0  ;;  %v1229_v31 = vmax.f32 %v1171_v29, 0.0 }
 0x165   : > { %v694_v32 = vpop.f32.mrf.mxu0  ;;  %v837_v33 = vpop.f32.mrf.mxu1 }
 0x166   : > { %v1086_v34 = vmax.f32 %v918_v27, %v1061_v30  ;;  %v695_v35 = vadd.f32 %v1874_v52, %v694_v32  ;;  %v838_v36 = vadd.f32 %v1874_v52, %v837_v33 }
 0x168   : > { %v1254_v37 = vmax.f32 %v1086_v34, %v1229_v31  ;;  %v751_v38 = vmax.f32 %v695_v35, 0.0  ;;  %v894_v39 = vmax.f32 %v838_v36, 0.0 }
 0x169   : > { %v1005_v40 = vpop.f32.mrf.mxu2  ;;  %v1173_v41 = vpop.f32.mrf.mxu3 }
 0x16a   : > { %1279 = vst [vmem:[%s1893_s23 + $0x40] sm:$0xff] %v1254_v37  ;;  %v919_v42 = vmax.f32 %v751_v38, %v894_v39  ;;  %v1006_v43 = vadd.f32 %v1874_v52, %v1005_v40  ;;  %v1174_v44 = vadd.f32 %v1874_v52, %v1173_v41 }
 0x16c   : > { %v1062_v45 = vmax.f32 %v1006_v43, 0.0  ;;  %v1230_v46 = vmax.f32 %v1174_v44, 0.0 }
 0x16d   : > { %v697_v47 = vpop.f32.mrf.mxu0  ;;  %v840_v48 = vpop.f32.mrf.mxu1 }
 0x16e   : > { %v1087_v49 = vmax.f32 %v919_v42, %v1062_v45  ;;  %v698_v50 = vadd.f32 %v1874_v52, %v697_v47  ;;  %v841_v51 = vadd.f32 %v1874_v52, %v840_v48 }
 0x170   : > { %v1255_v53 = vmax.f32 %v1087_v49, %v1230_v46  ;;  %v752_v54 = vmax.f32 %v698_v50, 0.0  ;;  %v895_v55 = vmax.f32 %v841_v51, 0.0 }
 0x171   : > { %v1008_v56 = vpop.f32.mrf.mxu2  ;;  %v1176_v57 = vpop.f32.mrf.mxu3 }
 0x172   : > { %1280 = vst [vmem:[%s1893_s23 + $0x48] sm:$0xff] %v1255_v53  ;;  %v920_v58 = vmax.f32 %v752_v54, %v895_v55  ;;  %v1009_v59 = vadd.f32 %v1874_v52, %v1008_v56  ;;  %v1177_v60 = vadd.f32 %v1874_v52, %v1176_v57 }
 0x174   : > { %v1063_v61 = vmax.f32 %v1009_v59, 0.0  ;;  %v1231_v62 = vmax.f32 %v1177_v60, 0.0 }
 0x175   : > { %v700_v63 = vpop.f32.mrf.mxu0  ;;  %v843_v0 = vpop.f32.mrf.mxu1 }
 0x176   : > { %v1088_v1 = vmax.f32 %v920_v58, %v1063_v61  ;;  %v701_v2 = vadd.f32 %v1874_v52, %v700_v63  ;;  %v844_v3 = vadd.f32 %v1874_v52, %v843_v0 }
 0x178   : > { %v1256_v4 = vmax.f32 %v1088_v1, %v1231_v62  ;;  %v753_v5 = vmax.f32 %v701_v2, 0.0  ;;  %v896_v6 = vmax.f32 %v844_v3, 0.0 }
 0x179   : > { %v1011_v7 = vpop.f32.mrf.mxu2  ;;  %v1179_v8 = vpop.f32.mrf.mxu3 }
 0x17a   : > { %1281 = vst [vmem:[%s1893_s23 + $0x50] sm:$0xff] %v1256_v4  ;;  %v921_v9 = vmax.f32 %v753_v5, %v896_v6  ;;  %v1012_v10 = vadd.f32 %v1874_v52, %v1011_v7  ;;  %v1180_v11 = vadd.f32 %v1874_v52, %v1179_v8 }
 0x17c   : > { %v1064_v12 = vmax.f32 %v1012_v10, 0.0  ;;  %v1232_v13 = vmax.f32 %v1180_v11, 0.0 }
 0x17d   : > { %v703_v14 = vpop.f32.mrf.mxu0  ;;  %v846_v15 = vpop.f32.mrf.mxu1 }
 0x17e   : > { %v1089_v16 = vmax.f32 %v921_v9, %v1064_v12  ;;  %v704_v17 = vadd.f32 %v1874_v52, %v703_v14  ;;  %v847_v18 = vadd.f32 %v1874_v52, %v846_v15 }
 0x180   : > { %v1257_v19 = vmax.f32 %v1089_v16, %v1232_v13  ;;  %v754_v20 = vmax.f32 %v704_v17, 0.0  ;;  %v897_v21 = vmax.f32 %v847_v18, 0.0 }
 0x181   : > { %v1014_v22 = vpop.f32.mrf.mxu2  ;;  %v1182_v23 = vpop.f32.mrf.mxu3 }
 0x182   : > { %1282 = vst [vmem:[%s1893_s23 + $0x58] sm:$0xff] %v1257_v19  ;;  %v922_v24 = vmax.f32 %v754_v20, %v897_v21  ;;  %v1015_v25 = vadd.f32 %v1874_v52, %v1014_v22  ;;  %v1183_v26 = vadd.f32 %v1874_v52, %v1182_v23 }
 0x184   : > { %v1065_v27 = vmax.f32 %v1015_v25, 0.0  ;;  %v1233_v28 = vmax.f32 %v1183_v26, 0.0 }
 0x185   : > { %v706_v29 = vpop.f32.mrf.mxu0  ;;  %v849_v30 = vpop.f32.mrf.mxu1 }
 0x186   : > { %v1090_v31 = vmax.f32 %v922_v24, %v1065_v27  ;;  %v707_v32 = vadd.f32 %v1874_v52, %v706_v29  ;;  %v850_v33 = vadd.f32 %v1874_v52, %v849_v30 }
 0x188   : > { %v1258_v34 = vmax.f32 %v1090_v31, %v1233_v28  ;;  %v755_v35 = vmax.f32 %v707_v32, 0.0  ;;  %v898_v36 = vmax.f32 %v850_v33, 0.0 }
 0x189   : > { %v1017_v37 = vpop.f32.mrf.mxu2  ;;  %v1185_v38 = vpop.f32.mrf.mxu3 }
 0x18a   : > { %1283 = vst [vmem:[%s1893_s23 + $0x60] sm:$0xff] %v1258_v34  ;;  %v923_v39 = vmax.f32 %v755_v35, %v898_v36  ;;  %v1018_v40 = vadd.f32 %v1874_v52, %v1017_v37  ;;  %v1186_v41 = vadd.f32 %v1874_v52, %v1185_v38 }
 0x18c   : > { %v1066_v42 = vmax.f32 %v1018_v40, 0.0  ;;  %v1234_v43 = vmax.f32 %v1186_v41, 0.0 }
 0x18d   : > { %v709_v44 = vpop.f32.mrf.mxu0  ;;  %v852_v45 = vpop.f32.mrf.mxu1 }
 0x18e   : > { %v1091_v46 = vmax.f32 %v923_v39, %v1066_v42  ;;  %v710_v47 = vadd.f32 %v1874_v52, %v709_v44  ;;  %v853_v48 = vadd.f32 %v1874_v52, %v852_v45 }
 0x190   : > { %v1259_v49 = vmax.f32 %v1091_v46, %v1234_v43  ;;  %v756_v50 = vmax.f32 %v710_v47, 0.0  ;;  %v899_v51 = vmax.f32 %v853_v48, 0.0 }
 0x191   : > { %v1020_v53 = vpop.f32.mrf.mxu2  ;;  %v1188_v54 = vpop.f32.mrf.mxu3 }
 0x192   : > { %1284 = vst [vmem:[%s1893_s23 + $0x68] sm:$0xff] %v1259_v49  ;;  %v924_v55 = vmax.f32 %v756_v50, %v899_v51  ;;  %v1021_v56 = vadd.f32 %v1874_v52, %v1020_v53  ;;  %v1189_v57 = vadd.f32 %v1874_v52, %v1188_v54 }
 0x194   : > { %v1067_v58 = vmax.f32 %v1021_v56, 0.0  ;;  %v1235_v59 = vmax.f32 %v1189_v57, 0.0 }
 0x195   : > { %v712_v60 = vpop.f32.mrf.mxu0  ;;  %v855_v61 = vpop.f32.mrf.mxu1 }
 0x196   : > { %v1092_v62 = vmax.f32 %v924_v55, %v1067_v58  ;;  %v713_v63 = vadd.f32 %v1874_v52, %v712_v60  ;;  %v856_v0 = vadd.f32 %v1874_v52, %v855_v61 }
 0x198   : > { %v1260_v1 = vmax.f32 %v1092_v62, %v1235_v59  ;;  %v757_v2 = vmax.f32 %v713_v63, 0.0  ;;  %v900_v3 = vmax.f32 %v856_v0, 0.0 }
 0x199   : > { %v1023_v4 = vpop.f32.mrf.mxu2  ;;  %v1191_v5 = vpop.f32.mrf.mxu3 }
 0x19a   : > { %1285 = vst [vmem:[%s1893_s23 + $0x70] sm:$0xff] %v1260_v1  ;;  %v925_v6 = vmax.f32 %v757_v2, %v900_v3  ;;  %v1024_v7 = vadd.f32 %v1874_v52, %v1023_v4  ;;  %v1192_v8 = vadd.f32 %v1874_v52, %v1191_v5 }
 0x19c   : > { %v1068_v9 = vmax.f32 %v1024_v7, 0.0  ;;  %v1236_v10 = vmax.f32 %v1192_v8, 0.0 }
 0x19d   : > { %v715_v11 = vpop.f32.mrf.mxu0  ;;  %v858_v12 = vpop.f32.mrf.mxu1 }
 0x19e   : > { %v1093_v13 = vmax.f32 %v925_v6, %v1068_v9  ;;  %v716_v14 = vadd.f32 %v1874_v52, %v715_v11  ;;  %v859_v15 = vadd.f32 %v1874_v52, %v858_v12 }
 0x1a0   : > { %v1261_v16 = vmax.f32 %v1093_v13, %v1236_v10  ;;  %v758_v17 = vmax.f32 %v716_v14, 0.0  ;;  %v901_v18 = vmax.f32 %v859_v15, 0.0 }
 0x1a1   : > { %v1026_v19 = vpop.f32.mrf.mxu2  ;;  %v1194_v20 = vpop.f32.mrf.mxu3 }
 0x1a2   : > { %1286 = vst [vmem:[%s1893_s23 + $0x78] sm:$0xff] %v1261_v16  ;;  %v926_v21 = vmax.f32 %v758_v17, %v901_v18  ;;  %v1027_v22 = vadd.f32 %v1874_v52, %v1026_v19  ;;  %v1195_v23 = vadd.f32 %v1874_v52, %v1194_v20 }
 0x1a4   : > { %v1069_v24 = vmax.f32 %v1027_v22, 0.0  ;;  %v1237_v25 = vmax.f32 %v1195_v23, 0.0 }
 0x1a5   : > { %v718_v26 = vpop.f32.mrf.mxu0  ;;  %v861_v27 = vpop.f32.mrf.mxu1 }
 0x1a6   : > { %v1094_v28 = vmax.f32 %v926_v21, %v1069_v24  ;;  %v719_v29 = vadd.f32 %v1874_v52, %v718_v26  ;;  %v862_v30 = vadd.f32 %v1874_v52, %v861_v27 }
 0x1a8   : > { %v1262_v31 = vmax.f32 %v1094_v28, %v1237_v25  ;;  %v759_v32 = vmax.f32 %v719_v29, 0.0  ;;  %v902_v33 = vmax.f32 %v862_v30, 0.0 }
 0x1a9   : > { %v1029_v34 = vpop.f32.mrf.mxu2  ;;  %v1197_v35 = vpop.f32.mrf.mxu3 }
 0x1aa   : > { %1287 = vst [vmem:[%s1893_s23 + $0x80] sm:$0xff] %v1262_v31  ;;  %v927_v36 = vmax.f32 %v759_v32, %v902_v33  ;;  %v1030_v37 = vadd.f32 %v1874_v52, %v1029_v34  ;;  %v1198_v38 = vadd.f32 %v1874_v52, %v1197_v35 }
 0x1ac   : > { %v1070_v39 = vmax.f32 %v1030_v37, 0.0  ;;  %v1238_v40 = vmax.f32 %v1198_v38, 0.0 }
 0x1ad   : > { %v721_v41 = vpop.f32.mrf.mxu0  ;;  %v864_v42 = vpop.f32.mrf.mxu1 }
 0x1ae   : > { %v1095_v43 = vmax.f32 %v927_v36, %v1070_v39  ;;  %v722_v44 = vadd.f32 %v1874_v52, %v721_v41  ;;  %v865_v45 = vadd.f32 %v1874_v52, %v864_v42 }
 0x1b0   : > { %v1263_v46 = vmax.f32 %v1095_v43, %v1238_v40  ;;  %v760_v47 = vmax.f32 %v722_v44, 0.0  ;;  %v903_v48 = vmax.f32 %v865_v45, 0.0 }
 0x1b1   : > { %v1032_v49 = vpop.f32.mrf.mxu2  ;;  %v1200_v50 = vpop.f32.mrf.mxu3 }
 0x1b2   : > { %1288 = vst [vmem:[%s1893_s23 + $0x88] sm:$0xff] %v1263_v46  ;;  %v928_v51 = vmax.f32 %v760_v47, %v903_v48  ;;  %v1033_v53 = vadd.f32 %v1874_v52, %v1032_v49  ;;  %v1201_v54 = vadd.f32 %v1874_v52, %v1200_v50 }
 0x1b4   : > { %v1071_v55 = vmax.f32 %v1033_v53, 0.0  ;;  %v1239_v56 = vmax.f32 %v1201_v54, 0.0 }
 0x1b5   : > { %v724_v57 = vpop.f32.mrf.mxu0  ;;  %v867_v58 = vpop.f32.mrf.mxu1 }
 0x1b6   : > { %v1096_v59 = vmax.f32 %v928_v51, %v1071_v55  ;;  %v725_v60 = vadd.f32 %v1874_v52, %v724_v57  ;;  %v868_v61 = vadd.f32 %v1874_v52, %v867_v58 }
 0x1b8   : > { %v1264_v62 = vmax.f32 %v1096_v59, %v1239_v56  ;;  %v761_v63 = vmax.f32 %v725_v60, 0.0  ;;  %v904_v0 = vmax.f32 %v868_v61, 0.0 }
 0x1b9   : > { %v1035_v1 = vpop.f32.mrf.mxu2  ;;  %v1203_v2 = vpop.f32.mrf.mxu3 }
 0x1ba   : > { %1289 = vst [vmem:[%s1893_s23 + $0x90] sm:$0xff] %v1264_v62  ;;  %v929_v3 = vmax.f32 %v761_v63, %v904_v0  ;;  %v1036_v4 = vadd.f32 %v1874_v52, %v1035_v1  ;;  %v1204_v5 = vadd.f32 %v1874_v52, %v1203_v2 }
 0x1bc   : > { %v1072_v6 = vmax.f32 %v1036_v4, 0.0  ;;  %v1240_v7 = vmax.f32 %v1204_v5, 0.0 }
 0x1bd   : > { %v727_v8 = vpop.f32.mrf.mxu0  ;;  %v870_v9 = vpop.f32.mrf.mxu1 }
 0x1be   : > { %v1097_v10 = vmax.f32 %v929_v3, %v1072_v6  ;;  %v728_v11 = vadd.f32 %v1874_v52, %v727_v8  ;;  %v871_v12 = vadd.f32 %v1874_v52, %v870_v9 }
 0x1c0   : > { %v1265_v13 = vmax.f32 %v1097_v10, %v1240_v7  ;;  %v762_v14 = vmax.f32 %v728_v11, 0.0  ;;  %v905_v15 = vmax.f32 %v871_v12, 0.0 }
 0x1c1   : > { %v1038_v16 = vpop.f32.mrf.mxu2  ;;  %v1206_v17 = vpop.f32.mrf.mxu3 }
 0x1c2   : > { %1290 = vst [vmem:[%s1893_s23 + $0x98] sm:$0xff] %v1265_v13  ;;  %v930_v18 = vmax.f32 %v762_v14, %v905_v15  ;;  %v1039_v19 = vadd.f32 %v1874_v52, %v1038_v16  ;;  %v1207_v20 = vadd.f32 %v1874_v52, %v1206_v17 }
 0x1c4   : > { %v1073_v21 = vmax.f32 %v1039_v19, 0.0  ;;  %v1241_v22 = vmax.f32 %v1207_v20, 0.0 }
 0x1c5   : > { %v730_v23 = vpop.f32.mrf.mxu0  ;;  %v873_v24 = vpop.f32.mrf.mxu1 }
 0x1c6   : > { %v1098_v25 = vmax.f32 %v930_v18, %v1073_v21  ;;  %v731_v26 = vadd.f32 %v1874_v52, %v730_v23  ;;  %v874_v27 = vadd.f32 %v1874_v52, %v873_v24 }
 0x1c8   : > { %v1266_v28 = vmax.f32 %v1098_v25, %v1241_v22  ;;  %v763_v29 = vmax.f32 %v731_v26, 0.0  ;;  %v906_v30 = vmax.f32 %v874_v27, 0.0 }
 0x1c9   : > { %v1041_v31 = vpop.f32.mrf.mxu2  ;;  %v1209_v32 = vpop.f32.mrf.mxu3 }
 0x1ca   : > { %1291 = vst [vmem:[%s1893_s23 + $0xa0] sm:$0xff] %v1266_v28  ;;  %v931_v33 = vmax.f32 %v763_v29, %v906_v30  ;;  %v1042_v34 = vadd.f32 %v1874_v52, %v1041_v31  ;;  %v1210_v35 = vadd.f32 %v1874_v52, %v1209_v32 }
 0x1cc   : > { %v1074_v36 = vmax.f32 %v1042_v34, 0.0  ;;  %v1242_v37 = vmax.f32 %v1210_v35, 0.0 }
 0x1cd   : > { %v733_v38 = vpop.f32.mrf.mxu0  ;;  %v876_v39 = vpop.f32.mrf.mxu1 }
 0x1ce   : > { %v1099_v40 = vmax.f32 %v931_v33, %v1074_v36  ;;  %v734_v41 = vadd.f32 %v1874_v52, %v733_v38  ;;  %v877_v42 = vadd.f32 %v1874_v52, %v876_v39 }
 0x1d0   : > { %v1267_v43 = vmax.f32 %v1099_v40, %v1242_v37  ;;  %v764_v44 = vmax.f32 %v734_v41, 0.0  ;;  %v907_v45 = vmax.f32 %v877_v42, 0.0 }
 0x1d1   : > { %v1044_v46 = vpop.f32.mrf.mxu2  ;;  %v1212_v47 = vpop.f32.mrf.mxu3 }
 0x1d2   : > { %1292 = vst [vmem:[%s1893_s23 + $0xa8] sm:$0xff] %v1267_v43  ;;  %v932_v48 = vmax.f32 %v764_v44, %v907_v45  ;;  %v1045_v49 = vadd.f32 %v1874_v52, %v1044_v46  ;;  %v1213_v50 = vadd.f32 %v1874_v52, %v1212_v47 }
 0x1d4   : > { %v1075_v51 = vmax.f32 %v1045_v49, 0.0  ;;  %v1243_v53 = vmax.f32 %v1213_v50, 0.0 }
 0x1d5   : > { %v736_v54 = vpop.f32.mrf.mxu0  ;;  %v879_v55 = vpop.f32.mrf.mxu1 }
 0x1d6   : > { %v1100_v56 = vmax.f32 %v932_v48, %v1075_v51  ;;  %v737_v57 = vadd.f32 %v1874_v52, %v736_v54  ;;  %v880_v58 = vadd.f32 %v1874_v52, %v879_v55 }
 0x1d8   : > { %v1268_v59 = vmax.f32 %v1100_v56, %v1243_v53  ;;  %v765_v60 = vmax.f32 %v737_v57, 0.0  ;;  %v908_v61 = vmax.f32 %v880_v58, 0.0 }
 0x1d9   : > { %v1047_v62 = vpop.f32.mrf.mxu2  ;;  %v1215_v63 = vpop.f32.mrf.mxu3 }
 0x1da   : > { %1293 = vst [vmem:[%s1893_s23 + $0xb0] sm:$0xff] %v1268_v59  ;;  %v933_v0 = vmax.f32 %v765_v60, %v908_v61  ;;  %v1048_v1 = vadd.f32 %v1874_v52, %v1047_v62  ;;  %v1216_v2 = vadd.f32 %v1874_v52, %v1215_v63 }
 0x1dc   : > { %v1076_v3 = vmax.f32 %v1048_v1, 0.0  ;;  %v1244_v4 = vmax.f32 %v1216_v2, 0.0 }
 0x1dd   : > { %v739_v5 = vpop.f32.mrf.mxu0  ;;  %v882_v6 = vpop.f32.mrf.mxu1 }
 0x1de   : > { %v1101_v7 = vmax.f32 %v933_v0, %v1076_v3  ;;  %v740_v8 = vadd.f32 %v1874_v52, %v739_v5  ;;  %v883_v9 = vadd.f32 %v1874_v52, %v882_v6 }
 0x1e0   : > { %v1269_v10 = vmax.f32 %v1101_v7, %v1244_v4  ;;  %v766_v11 = vmax.f32 %v740_v8, 0.0  ;;  %v909_v12 = vmax.f32 %v883_v9, 0.0 }
 0x1e1   : > { %v1050_v13 = vpop.f32.mrf.mxu2  ;;  %v1218_v14 = vpop.f32.mrf.mxu3 }
 0x1e2   : > { %1294 = vst [vmem:[%s1893_s23 + $0xb8] sm:$0xff] %v1269_v10  ;;  %v934_v15 = vmax.f32 %v766_v11, %v909_v12  ;;  %v1051_v16 = vadd.f32 %v1874_v52, %v1050_v13  ;;  %v1219_v17 = vadd.f32 %v1874_v52, %v1218_v14 }
 0x1e4   : > { %v1077_v18 = vmax.f32 %v1051_v16, 0.0  ;;  %v1245_v19 = vmax.f32 %v1219_v17, 0.0 }
 0x1e6   : > { %v1102_v20 = vmax.f32 %v934_v15, %v1077_v18 }
 0x1e8   : > { %v1270_v21 = vmax.f32 %v1102_v20, %v1245_v19 }
 0x1ea   : > { %1295 = vst [vmem:[%s1893_s23 + $0xc0] sm:$0xff] %v1270_v21 }
 0x1eb PF: > { %p10_p9 = scmp.ge.s32.totalorder %s1531_s16, 4   ;;  %s2056_s12 = smov %s1488_s13 }
 0x1ec   : > { %s2057_s13 = smov %s1540_s19  ;;  %s2058_s14 = smov %s1531_s16 }
 0x1ed   :  { %12 = sbr.rel (!%p10_p9) target bundleno = 2 (0x2), region = 108 }

// kernel: thnet_forward.4
= control target key start
LH: loop header
LB: loop body
LE: loop exit
PB: predicated region body
PF: predicated region fallthrough
CT: control target
= control target key end

     0   :  { %s1097_s1 = inlined_call_operand.vmem [shape: f32[256,128], index: 1, kind: input, shape index: {}]   ;;  %s1098_s2 = inlined_call_operand.vmem [shape: f32[1,128], index: 2, kind: input, shape index: {}]   ;;  %s1099_s0 = inlined_call_operand.vmem [shape: f32[4,56,256], index: 0, kind: input, shape index: {}]   ;;  %s1100_s3 = inlined_call_operand.vmem [shape: f32[56,128], index: 3, kind: output, shape index: {}]  }
   0x1   :  { %v539_v0 = vld [vmem:[%s1097_s1 + $0x78] sm:$0xff]  ;;  %v544_v1 = vld [vmem:[%s1097_s1 + $0x70] sm:$0xff]  ;;  %v563_v4 = vld [vmem:[%s1097_s1 + $0x68] sm:$0xff] }
   0x2   :  { %v549_v2 = vld [vmem:[%s1097_s1 + $0xf8] sm:$0xff]  ;;  %64 = vmatpush.msra.mxu0 %v539_v0  ;;  %162 = vmatpush.msra.mxu2 %v539_v0  ;;  %v556_v3 = vld [vmem:[%s1097_s1 + $0xf0] sm:$0xff]  ;;  %v570_v5 = vld [vmem:[%s1097_s1 + $0xe8] sm:$0xff] }
   0x3   :  { %102 = vmatpush.msra.mxu1 %v549_v2  ;;  %200 = vmatpush.msra.mxu3 %v549_v2  ;;  %v577_v6 = vld [vmem:[%s1097_s1 + $0x60] sm:$0xff]  ;;  %v591_v8 = vld [vmem:[%s1097_s1 + $0x58] sm:$0xff]  ;;  %v605_v10 = vld [vmem:[%s1097_s1 + $0x50] sm:$0xff] }
   0x4   :  { %65 = vmatpush.msra.mxu0 %v544_v1  ;;  %163 = vmatpush.msra.mxu2 %v544_v1  ;;  %v584_v7 = vld [vmem:[%s1097_s1 + $0xe0] sm:$0xff]  ;;  %v598_v9 = vld [vmem:[%s1097_s1 + $0xd8] sm:$0xff]  ;;  %v612_v11 = vld [vmem:[%s1097_s1 + $0xd0] sm:$0xff] }
   0x5   :  { %103 = vmatpush.msra.mxu1 %v556_v3  ;;  %201 = vmatpush.msra.mxu3 %v556_v3  ;;  %v619_v12 = vld [vmem:[%s1097_s1 + $0x48] sm:$0xff]  ;;  %v633_v14 = vld [vmem:[%s1097_s1 + $0x40] sm:$0xff]  ;;  %v647_v16 = vld [vmem:[%s1097_s1 + $0x38] sm:$0xff] }
   0x6   :  { %66 = vmatpush.msra.mxu0 %v563_v4  ;;  %164 = vmatpush.msra.mxu2 %v563_v4  ;;  %v626_v13 = vld [vmem:[%s1097_s1 + $0xc8] sm:$0xff]  ;;  %v640_v15 = vld [vmem:[%s1097_s1 + $0xc0] sm:$0xff]  ;;  %v654_v17 = vld [vmem:[%s1097_s1 + $0xb8] sm:$0xff] }
   0x7   :  { %104 = vmatpush.msra.mxu1 %v570_v5  ;;  %202 = vmatpush.msra.mxu3 %v570_v5  ;;  %v661_v18 = vld [vmem:[%s1097_s1 + $0x30] sm:$0xff]  ;;  %v675_v20 = vld [vmem:[%s1097_s1 + $0x28] sm:$0xff]  ;;  %v689_v22 = vld [vmem:[%s1097_s1 + $0x20] sm:$0xff] }
   0x8   :  { %67 = vmatpush.msra.mxu0 %v577_v6  ;;  %165 = vmatpush.msra.mxu2 %v577_v6  ;;  %v668_v19 = vld [vmem:[%s1097_s1 + $0xb0] sm:$0xff]  ;;  %v682_v21 = vld [vmem:[%s1097_s1 + $0xa8] sm:$0xff]  ;;  %v696_v23 = vld [vmem:[%s1097_s1 + $0xa0] sm:$0xff] }
   0x9   :  { %105 = vmatpush.msra.mxu1 %v584_v7  ;;  %203 = vmatpush.msra.mxu3 %v584_v7  ;;  %v703_v24 = vld [vmem:[%s1097_s1 + $0x18] sm:$0xff]  ;;  %v717_v26 = vld [vmem:[%s1097_s1 + $0x10] sm:$0xff]  ;;  %v731_v28 = vld [vmem:[%s1097_s1 + $0x8] sm:$0xff] }
   0xa   :  { %68 = vmatpush.msra.mxu0 %v591_v8  ;;  %166 = vmatpush.msra.mxu2 %v591_v8  ;;  %v710_v25 = vld [vmem:[%s1097_s1 + $0x98] sm:$0xff]  ;;  %v724_v27 = vld [vmem:[%s1097_s1 + $0x90] sm:$0xff]  ;;  %v738_v29 = vld [vmem:[%s1097_s1 + $0x88] sm:$0xff] }
   0xb   :  { %106 = vmatpush.msra.mxu1 %v598_v9  ;;  %204 = vmatpush.msra.mxu3 %v598_v9  ;;  %v745_v30 = vld [vmem:[%s1097_s1] sm:$0xff]  ;;  %v473_v32 = vld [vmem:[%s1099_s0 + $0x70] sm:$0xff]  ;;  %v48_v34 = vld [vmem:[%s1099_s0 + $0x8] sm:$0xff] }
   0xc   :  { %69 = vmatpush.msra.mxu0 %v605_v10  ;;  %167 = vmatpush.msra.mxu2 %v605_v10  ;;  %v47_v31 = vld [vmem:[%s1099_s0] sm:$0xff]  ;;  %v474_v35 = vld [vmem:[%s1099_s0 + $0x78] sm:$0xff]  ;;  %v49_v36 = vld [vmem:[%s1099_s0 + $0x10] sm:$0xff] }
   0xd   :  { %107 = vmatpush.msra.mxu1 %v612_v11  ;;  %205 = vmatpush.msra.mxu3 %v612_v11  ;;  %v760_v33 = vld [vmem:[%s1097_s1 + $0x80] sm:$0xff]  ;;  %v50_v38 = vld [vmem:[%s1099_s0 + $0x18] sm:$0xff]  ;;  %v476_v39 = vld [vmem:[%s1099_s0 + $0x88] sm:$0xff] }
   0xe   :  { %70 = vmatpush.msra.mxu0 %v619_v12  ;;  %168 = vmatpush.msra.mxu2 %v619_v12  ;;  %v475_v37 = vld [vmem:[%s1099_s0 + $0x80] sm:$0xff]  ;;  %v477_v41 = vld [vmem:[%s1099_s0 + $0x90] sm:$0xff]  ;;  %v52_v42 = vld [vmem:[%s1099_s0 + $0x28] sm:$0xff] }
   0xf   :  { %108 = vmatpush.msra.mxu1 %v626_v13  ;;  %206 = vmatpush.msra.mxu3 %v626_v13  ;;  %v51_v40 = vld [vmem:[%s1099_s0 + $0x20] sm:$0xff]  ;;  %v478_v43 = vld [vmem:[%s1099_s0 + $0x98] sm:$0xff]  ;;  %v53_v44 = vld [vmem:[%s1099_s0 + $0x30] sm:$0xff] }
  0x10   :  { %71 = vmatpush.msra.mxu0 %v633_v14  ;;  %169 = vmatpush.msra.mxu2 %v633_v14  ;;  %v479_v45 = vld [vmem:[%s1099_s0 + $0xa0] sm:$0xff]  ;;  %v54_v46 = vld [vmem:[%s1099_s0 + $0x38] sm:$0xff]  ;;  %v480_v47 = vld [vmem:[%s1099_s0 + $0xa8] sm:$0xff] }
  0x11   :  { %109 = vmatpush.msra.mxu1 %v640_v15  ;;  %207 = vmatpush.msra.mxu3 %v640_v15  ;;  %v55_v48 = vld [vmem:[%s1099_s0 + $0x40] sm:$0xff]  ;;  %v481_v49 = vld [vmem:[%s1099_s0 + $0xb0] sm:$0xff]  ;;  %v56_v50 = vld [vmem:[%s1099_s0 + $0x48] sm:$0xff] }
  0x12   :  { %72 = vmatpush.msra.mxu0 %v647_v16  ;;  %170 = vmatpush.msra.mxu2 %v647_v16  ;;  %v482_v51 = vld [vmem:[%s1099_s0 + $0xb8] sm:$0xff]  ;;  %v57_v52 = vld [vmem:[%s1099_s0 + $0x50] sm:$0xff]  ;;  %v483_v53 = vld [vmem:[%s1099_s0 + $0xc0] sm:$0xff] }
  0x13   :  { %110 = vmatpush.msra.mxu1 %v654_v17  ;;  %208 = vmatpush.msra.mxu3 %v654_v17  ;;  %v58_v54 = vld [vmem:[%s1099_s0 + $0x58] sm:$0xff]  ;;  %v484_v55 = vld [vmem:[%s1099_s0 + $0xc8] sm:$0xff]  ;;  %v59_v56 = vld [vmem:[%s1099_s0 + $0x60] sm:$0xff] }
  0x14   :  { %73 = vmatpush.msra.mxu0 %v661_v18  ;;  %171 = vmatpush.msra.mxu2 %v661_v18  ;;  %v485_v57 = vld [vmem:[%s1099_s0 + $0xd0] sm:$0xff]  ;;  %v60_v58 = vld [vmem:[%s1099_s0 + $0x68] sm:$0xff]  ;;  %v486_v59 = vld [vmem:[%s1099_s0 + $0xd8] sm:$0xff] }
  0x15   :  { %111 = vmatpush.msra.mxu1 %v668_v19  ;;  %209 = vmatpush.msra.mxu3 %v668_v19  ;;  %v487_v60 = vld [vmem:[%s1099_s0 + $0xe0] sm:$0xff]  ;;  %v501_v61 = vld [vmem:[%s1099_s0 + $0x150] sm:$0xff]  ;;  %v488_v62 = vld [vmem:[%s1099_s0 + $0xe8] sm:$0xff] }
  0x16   :  { %74 = vmatpush.msra.mxu0 %v675_v20  ;;  %172 = vmatpush.msra.mxu2 %v675_v20  ;;  %v502_v63 = vld [vmem:[%s1099_s0 + $0x158] sm:$0xff] }
  0x17   :  { %112 = vmatpush.msra.mxu1 %v682_v21  ;;  %210 = vmatpush.msra.mxu3 %v682_v21 }
  0x18   :  { %75 = vmatpush.msra.mxu0 %v689_v22  ;;  %173 = vmatpush.msra.mxu2 %v689_v22 }
  0x19   :  { %113 = vmatpush.msra.mxu1 %v696_v23  ;;  %211 = vmatpush.msra.mxu3 %v696_v23 }
  0x1a   :  { %76 = vmatpush.msra.mxu0 %v703_v24  ;;  %174 = vmatpush.msra.mxu2 %v703_v24 }
  0x1b   :  { %114 = vmatpush.msra.mxu1 %v710_v25  ;;  %212 = vmatpush.msra.mxu3 %v710_v25 }
  0x1c   :  { %77 = vmatpush.msra.mxu0 %v717_v26  ;;  %175 = vmatpush.msra.mxu2 %v717_v26 }
  0x1d   :  { %115 = vmatpush.msra.mxu1 %v724_v27  ;;  %213 = vmatpush.msra.mxu3 %v724_v27 }
  0x1e   :  { %78 = vmatpush.msra.mxu0 %v731_v28  ;;  %176 = vmatpush.msra.mxu2 %v731_v28 }
  0x1f   :  { %116 = vmatpush.msra.mxu1 %v738_v29  ;;  %214 = vmatpush.msra.mxu3 %v738_v29 }
  0x20   :  { %79 = vmatpush.msra.mxu0 %v745_v30  ;;  %177 = vmatpush.msra.mxu2 %v745_v30 }
  0x21   :  { %80 = vmatmul.f32.vlgmr.msra.gmra.mxu0 %v47_v31  ;;  %178 = vmatmul.f32.vlgmr.msra.gmra.mxu2 %v473_v32 }
  0x22   :  { %372 = vmatpush.msrb.mxu2 %v539_v0  ;;  %117 = vmatpush.msra.mxu1 %v760_v33 }
  0x23   :  { %215 = vmatpush.msra.mxu3 %v760_v33  ;;  %118 = vmatmul.f32.vlgmr.msra.gmra.mxu1 %v48_v34 }
  0x24   :  { %216 = vmatmul.f32.vlgmr.msra.gmra.mxu3 %v474_v35  ;;  %267 = vmatpush.msrb.mxu0 %v539_v0  ;;  %v489_v0 = vld [vmem:[%s1099_s0 + $0xf0] sm:$0xff] }
  0x25   :  { %410 = vmatpush.msrb.mxu3 %v549_v2  ;;  %373 = vmatpush.msrb.mxu2 %v544_v1 }
  0x26   :  { %305 = vmatpush.msrb.mxu1 %v549_v2  ;;  %268 = vmatpush.msrb.mxu0 %v544_v1  ;;  %v503_v1 = vld [vmem:[%s1099_s0 + $0x160] sm:$0xff]  ;;  %v490_v2 = vld [vmem:[%s1099_s0 + $0xf8] sm:$0xff] }
  0x27   :  { %411 = vmatpush.msrb.mxu3 %v556_v3  ;;  %374 = vmatpush.msrb.mxu2 %v563_v4 }
  0x28   :  { %306 = vmatpush.msrb.mxu1 %v556_v3  ;;  %269 = vmatpush.msrb.mxu0 %v563_v4  ;;  %v504_v3 = vld [vmem:[%s1099_s0 + $0x168] sm:$0xff]  ;;  %v491_v4 = vld [vmem:[%s1099_s0 + $0x100] sm:$0xff] }
  0x29   :  { %83 = vmatmul.f32.gmra.mxu0 %v49_v36  ;;  %181 = vmatmul.f32.gmra.mxu2 %v475_v37 }
  0x2a   :  { %412 = vmatpush.msrb.mxu3 %v570_v5  ;;  %375 = vmatpush.msrb.mxu2 %v577_v6 }
  0x2b   :  { %121 = vmatmul.f32.gmra.mxu1 %v50_v38  ;;  %270 = vmatpush.msrb.mxu0 %v577_v6  ;;  %v492_v6 = vld [vmem:[%s1099_s0 + $0x108] sm:$0xff] }
  0x2c   :  { %219 = vmatmul.f32.gmra.mxu3 %v476_v39  ;;  %307 = vmatpush.msrb.mxu1 %v570_v5  ;;  %v505_v5 = vld [vmem:[%s1099_s0 + $0x170] sm:$0xff] }
  0x2d   :  { %413 = vmatpush.msrb.mxu3 %v584_v7  ;;  %376 = vmatpush.msrb.mxu2 %v591_v8 }
  0x2e   :  { %308 = vmatpush.msrb.mxu1 %v584_v7  ;;  %271 = vmatpush.msrb.mxu0 %v591_v8  ;;  %v506_v7 = vld [vmem:[%s1099_s0 + $0x178] sm:$0xff]  ;;  %v493_v8 = vld [vmem:[%s1099_s0 + $0x110] sm:$0xff] }
  0x2f   :  { %414 = vmatpush.msrb.mxu3 %v598_v9  ;;  %377 = vmatpush.msrb.mxu2 %v605_v10 }
  0x30   :  { %309 = vmatpush.msrb.mxu1 %v598_v9  ;;  %272 = vmatpush.msrb.mxu0 %v605_v10  ;;  %v507_v9 = vld [vmem:[%s1099_s0 + $0x180] sm:$0xff]  ;;  %v494_v10 = vld [vmem:[%s1099_s0 + $0x118] sm:$0xff] }
  0x31   :  { %86 = vmatmul.f32.gmra.mxu0 %v51_v40  ;;  %184 = vmatmul.f32.gmra.mxu2 %v477_v41 }
  0x32   :  { %415 = vmatpush.msrb.mxu3 %v612_v11  ;;  %378 = vmatpush.msrb.mxu2 %v619_v12 }
  0x33   :  { %124 = vmatmul.f32.gmra.mxu1 %v52_v42  ;;  %273 = vmatpush.msrb.mxu0 %v619_v12  ;;  %v495_v12 = vld [vmem:[%s1099_s0 + $0x120] sm:$0xff] }
  0x34   :  { %222 = vmatmul.f32.gmra.mxu3 %v478_v43  ;;  %310 = vmatpush.msrb.mxu1 %v612_v11  ;;  %v508_v11 = vld [vmem:[%s1099_s0 + $0x188] sm:$0xff] }
  0x35   :  { %416 = vmatpush.msrb.mxu3 %v626_v13  ;;  %379 = vmatpush.msrb.mxu2 %v633_v14 }
  0x36   :  { %311 = vmatpush.msrb.mxu1 %v626_v13  ;;  %274 = vmatpush.msrb.mxu0 %v633_v14  ;;  %v509_v13 = vld [vmem:[%s1099_s0 + $0x190] sm:$0xff]  ;;  %v496_v14 = vld [vmem:[%s1099_s0 + $0x128] sm:$0xff] }
  0x37   :  { %417 = vmatpush.msrb.mxu3 %v640_v15  ;;  %380 = vmatpush.msrb.mxu2 %v647_v16 }
  0x38   :  { %312 = vmatpush.msrb.mxu1 %v640_v15  ;;  %275 = vmatpush.msrb.mxu0 %v647_v16  ;;  %v510_v15 = vld [vmem:[%s1099_s0 + $0x198] sm:$0xff]  ;;  %v497_v16 = vld [vmem:[%s1099_s0 + $0x130] sm:$0xff] }
  0x39   :  { %89 = vmatmul.f32.gmra.mxu0 %v53_v44  ;;  %187 = vmatmul.f32.gmra.mxu2 %v479_v45 }
  0x3a   :  { %418 = vmatpush.msrb.mxu3 %v654_v17  ;;  %381 = vmatpush.msrb.mxu2 %v661_v18 }
  0x3b   :  { %127 = vmatmul.f32.gmra.mxu1 %v54_v46  ;;  %276 = vmatpush.msrb.mxu0 %v661_v18  ;;  %v498_v18 = vld [vmem:[%s1099_s0 + $0x138] sm:$0xff] }
  0x3c   :  { %225 = vmatmul.f32.gmra.mxu3 %v480_v47  ;;  %313 = vmatpush.msrb.mxu1 %v654_v17  ;;  %v511_v17 = vld [vmem:[%s1099_s0 + $0x1a0] sm:$0xff] }
  0x3d   :  { %419 = vmatpush.msrb.mxu3 %v668_v19  ;;  %382 = vmatpush.msrb.mxu2 %v675_v20 }
  0x3e   :  { %314 = vmatpush.msrb.mxu1 %v668_v19  ;;  %277 = vmatpush.msrb.mxu0 %v675_v20  ;;  %v512_v19 = vld [vmem:[%s1099_s0 + $0x1a8] sm:$0xff]  ;;  %v499_v20 = vld [vmem:[%s1099_s0 + $0x140] sm:$0xff] }
  0x3f   :  { %420 = vmatpush.msrb.mxu3 %v682_v21  ;;  %383 = vmatpush.msrb.mxu2 %v689_v22 }
  0x40   :  { %315 = vmatpush.msrb.mxu1 %v682_v21  ;;  %278 = vmatpush.msrb.mxu0 %v689_v22  ;;  %v513_v21 = vld [vmem:[%s1099_s0 + $0x1b0] sm:$0xff]  ;;  %v500_v22 = vld [vmem:[%s1099_s0 + $0x148] sm:$0xff] }
  0x41   :  { %92 = vmatmul.f32.gmra.mxu0 %v55_v48  ;;  %190 = vmatmul.f32.gmra.mxu2 %v481_v49 }
  0x42   :  { %421 = vmatpush.msrb.mxu3 %v696_v23  ;;  %384 = vmatpush.msrb.mxu2 %v703_v24 }
  0x43   :  { %130 = vmatmul.f32.gmra.mxu1 %v56_v50  ;;  %279 = vmatpush.msrb.mxu0 %v703_v24  ;;  %v1025_v50 = vld [vmem:[%s1098_s2] ss:$0 sm:$0xff] }
  0x44   :  { %228 = vmatmul.f32.gmra.mxu3 %v482_v51  ;;  %316 = vmatpush.msrb.mxu1 %v696_v23  ;;  %v514_v23 = vld [vmem:[%s1099_s0 + $0x1b8] sm:$0xff] }
  0x45   :  { %422 = vmatpush.msrb.mxu3 %v710_v25  ;;  %385 = vmatpush.msrb.mxu2 %v717_v26 }
  0x46   :  { %317 = vmatpush.msrb.mxu1 %v710_v25  ;;  %280 = vmatpush.msrb.mxu0 %v717_v26 }
  0x47   :  { %423 = vmatpush.msrb.mxu3 %v724_v27  ;;  %386 = vmatpush.msrb.mxu2 %v731_v28 }
  0x48   :  { %318 = vmatpush.msrb.mxu1 %v724_v27  ;;  %281 = vmatpush.msrb.mxu0 %v731_v28 }
  0x49   :  { %95 = vmatmul.f32.gmra.mxu0 %v57_v52  ;;  %193 = vmatmul.f32.gmra.mxu2 %v483_v53 }
  0x4a   :  { %424 = vmatpush.msrb.mxu3 %v738_v29  ;;  %387 = vmatpush.msrb.mxu2 %v745_v30 }
  0x4b   :  { %133 = vmatmul.f32.gmra.mxu1 %v58_v54  ;;  %282 = vmatpush.msrb.mxu0 %v745_v30 }
  0x4c   :  { %231 = vmatmul.f32.gmra.mxu3 %v484_v55  ;;  %319 = vmatpush.msrb.mxu1 %v738_v29 }
  0x4d   :  { %425 = vmatpush.msrb.mxu3 %v760_v33 }
  0x4e   :  { %320 = vmatpush.msrb.mxu1 %v760_v33 }
  0x51   :  { %98 = vmatmul.f32.gmra.mxu0 %v59_v56  ;;  %196 = vmatmul.f32.gmra.mxu2 %v485_v57 }
  0x53   :  { %136 = vmatmul.f32.gmra.mxu1 %v60_v58 }
  0x54   :  { %234 = vmatmul.f32.gmra.mxu3 %v486_v59 }
  0x59   :  { %283 = vmatmul.f32.vlgmr.msrb.gmra.mxu0 %v487_v60  ;;  %388 = vmatmul.f32.vlgmr.msrb.gmra.mxu2 %v501_v61 }
  0x5b   :  { %321 = vmatmul.f32.vlgmr.msrb.gmra.mxu1 %v488_v62 }
  0x5c   :  { %426 = vmatmul.f32.vlgmr.msrb.gmra.mxu3 %v502_v63 }
  0x61   :  { %286 = vmatmul.f32.gmra.mxu0 %v489_v0  ;;  %391 = vmatmul.f32.gmra.mxu2 %v503_v1 }
  0x63   :  { %324 = vmatmul.f32.gmra.mxu1 %v490_v2 }
  0x64   :  { %429 = vmatmul.f32.gmra.mxu3 %v504_v3 }
  0x69   :  { %289 = vmatmul.f32.gmra.mxu0 %v491_v4  ;;  %394 = vmatmul.f32.gmra.mxu2 %v505_v5 }
  0x6b   :  { %327 = vmatmul.f32.gmra.mxu1 %v492_v6 }
  0x6c   :  { %432 = vmatmul.f32.gmra.mxu3 %v506_v7 }
  0x71   :  { %292 = vmatmul.f32.gmra.mxu0 %v493_v8  ;;  %397 = vmatmul.f32.gmra.mxu2 %v507_v9 }
  0x73   :  { %330 = vmatmul.f32.gmra.mxu1 %v494_v10 }
  0x74   :  { %435 = vmatmul.f32.gmra.mxu3 %v508_v11 }
  0x79   :  { %295 = vmatmul.f32.gmra.mxu0 %v495_v12  ;;  %400 = vmatmul.f32.gmra.mxu2 %v509_v13 }
  0x7b   :  { %333 = vmatmul.f32.gmra.mxu1 %v496_v14 }
  0x7c   :  { %438 = vmatmul.f32.gmra.mxu3 %v510_v15 }
  0x81   :  { %298 = vmatmul.f32.gmra.mxu0 %v497_v16  ;;  %403 = vmatmul.f32.gmra.mxu2 %v511_v17 }
  0x83   :  { %336 = vmatmul.f32.gmra.mxu1 %v498_v18 }
  0x84   :  { %441 = vmatmul.f32.gmra.mxu3 %v512_v19 }
  0x89   :  { %301 = vmatmul.f32.gmra.mxu0 %v499_v20  ;;  %406 = vmatmul.f32.gmra.mxu2 %v513_v21 }
  0x8b   :  { %339 = vmatmul.f32.gmra.mxu1 %v500_v22 }
  0x8c   :  { %444 = vmatmul.f32.gmra.mxu3 %v514_v23 }
  0x9e   :  { %v81_v24 = vpop.f32.mrf.mxu0 }
  0x9f   :  { %v82_v53 = vadd.f32 %v1025_v50, %v81_v24 }
  0xa0   :  { %v119_v25 = vpop.f32.mrf.mxu1 }
  0xa1   :  { %v120_v59 = vadd.f32 %v119_v25, %v82_v53 }
  0xa3   :  { %v140_v1 = vmax.f32 %v120_v59, 0.0 }
  0xa4   :  { %v179_v26 = vpop.f32.mrf.mxu2 }
  0xa5   :  { %v180_v51 = vadd.f32 %v1025_v50, %v179_v26 }
  0xa6   :  { %v84_v27 = vpop.f32.mrf.mxu0 }
  0xa7   :  { %v217_v28 = vpop.f32.mrf.mxu3  ;;  %v85_v2 = vadd.f32 %v1025_v50, %v84_v27 }
  0xa8   :  { %v122_v29 = vpop.f32.mrf.mxu1  ;;  %v218_v57 = vadd.f32 %v217_v28, %v180_v51 }
  0xa9   :  { %v123_v11 = vadd.f32 %v122_v29, %v85_v2 }
  0xaa   :  { %v238_v61 = vmax.f32 %v218_v57, 0.0 }
  0xab   :  { %v141_v20 = vmax.f32 %v123_v11, 0.0 }
  0xac   :  { %v182_v30 = vpop.f32.mrf.mxu2  ;;  %v245_v7 = vmax.f32 %v140_v1, %v238_v61 }
  0xad   :  { %v183_v62 = vadd.f32 %v1025_v50, %v182_v30 }
  0xae   :  { %v87_v31 = vpop.f32.mrf.mxu0 }
  0xaf   :  { %v220_v32 = vpop.f32.mrf.mxu3  ;;  %v88_v21 = vadd.f32 %v1025_v50, %v87_v31 }
  0xb0   :  { %v992_v33 = vpop.f32.mrf.mxu1  ;;  %v221_v8 = vadd.f32 %v220_v32, %v183_v62 }
  0xb1   :  { %v126_v30 = vadd.f32 %v992_v33, %v88_v21 }
  0xb2   :  { %v239_v15 = vmax.f32 %v221_v8, 0.0 }
  0xb4   :  { %v185_v34 = vpop.f32.mrf.mxu2  ;;  %v246_v26 = vmax.f32 %v141_v20, %v239_v15 }
  0xb5   :  { %v186_v16 = vadd.f32 %v1025_v50, %v185_v34 }
  0xb6   :  { %v994_v35 = vpop.f32.mrf.mxu0 }
  0xb7   :  { %v223_v36 = vpop.f32.mrf.mxu3  ;;  %v91_v59 = vadd.f32 %v1025_v50, %v994_v35 }
  0xb8   :  { %v996_v37 = vpop.f32.mrf.mxu1  ;;  %v224_v27 = vadd.f32 %v223_v36, %v186_v16 }
  0xb9   :  { %v129_v1 = vadd.f32 %v996_v37, %v91_v59 }
  0xba   :  { %v240_v53 = vmax.f32 %v224_v27, 0.0 }
  0xbc   :  { %v998_v38 = vpop.f32.mrf.mxu2 }
  0xbd   :  { %v189_v31 = vadd.f32 %v1025_v50, %v998_v38 }
  0xbe   :  { %v1000_v39 = vpop.f32.mrf.mxu0 }
  0xbf   :  { %v1002_v40 = vpop.f32.mrf.mxu3 }
  0xc0   :  { %v1004_v41 = vpop.f32.mrf.mxu1  ;;  %v227_v38 = vadd.f32 %v1002_v40, %v189_v31 }
  0xc2   :  { %v241_v35 = vmax.f32 %v227_v38, 0.0 }
  0xc4   :  { %v1006_v42 = vpop.f32.mrf.mxu2 }
  0xc6   :  { %v1008_v43 = vpop.f32.mrf.mxu0 }
  0xc7   :  { %v1010_v44 = vpop.f32.mrf.mxu3 }
  0xc8   :  { %v1012_v45 = vpop.f32.mrf.mxu1 }
  0xcc   :  { %v1014_v46 = vpop.f32.mrf.mxu2 }
  0xcd   :  { %v195_v20 = vadd.f32 %v1025_v50, %v1014_v46 }
  0xce   :  { %v1016_v47 = vpop.f32.mrf.mxu0 }
  0xcf   :  { %v1018_v48 = vpop.f32.mrf.mxu3  ;;  %v100_v59 = vadd.f32 %v1025_v50, %v1016_v47 }
  0xd0   :  { %v1020_v49 = vpop.f32.mrf.mxu1  ;;  %v233_v46 = vadd.f32 %v1018_v48, %v195_v20 }
  0xd1   :  { %v138_v38 = vadd.f32 %v1020_v49, %v100_v59 }
  0xd4   :  { %v1028_v52 = vpop.f32.mrf.mxu2 }
  0xd5   :  { %v198_v31 = vadd.f32 %v1025_v50, %v1028_v52 }
  0xd6   :  { %v284_v54 = vpop.f32.mrf.mxu0 }
  0xd7   :  { %v1031_v55 = vpop.f32.mrf.mxu3  ;;  %v285_v56 = vadd.f32 %v1025_v50, %v284_v54 }
  0xd8   :  { %v322_v58 = vpop.f32.mrf.mxu1  ;;  %v236_v52 = vadd.f32 %v1031_v55, %v198_v31 }
  0xd9   :  { %v323_v60 = vadd.f32 %v322_v58, %v285_v56  ;;  %v142_v58 = vmax.f32 %v126_v30, 0.0 }
  0xda   :  { %v244_v47 = vmax.f32 %v236_v52, 0.0 }
  0xdb   :  { %v343_v3 = vmax.f32 %v323_v60, 0.0  ;;  %v247_v62 = vmax.f32 %v142_v58, %v240_v53 }
  0xdc   :  { %v389_v63 = vpop.f32.mrf.mxu2 }
  0xdd   :  { %v390_v0 = vadd.f32 %v1025_v50, %v389_v63  ;;  %v350_v12 = vmax.f32 %v245_v7, %v343_v3 }
  0xde   :  { %v287_v4 = vpop.f32.mrf.mxu0 }
  0xdf   :  { %v288_v5 = vadd.f32 %v1025_v50, %v287_v4  ;;  %v427_v6 = vpop.f32.mrf.mxu3 }
  0xe0   :  { %v428_v9 = vadd.f32 %v427_v6, %v390_v0  ;;  %v325_v10 = vpop.f32.mrf.mxu1 }
  0xe1   :  { %v326_v14 = vadd.f32 %v325_v10, %v288_v5  ;;  %v192_v5 = vadd.f32 %v1025_v50, %v1006_v42  ;;  %v94_v10 = vadd.f32 %v1025_v50, %v1000_v39 }
  0xe2   :  { %v448_v13 = vmax.f32 %v428_v9, 0.0  ;;  %v143_v9 = vmax.f32 %v129_v1, 0.0 }
  0xe3   :  { %v344_v22 = vmax.f32 %v326_v14, 0.0  ;;  %v230_v42 = vadd.f32 %v1010_v44, %v192_v5  ;;  %v132_v16 = vadd.f32 %v1004_v41, %v94_v10 }
  0xe4   :  { %v455_v17 = vmax.f32 %v350_v12, %v448_v13  ;;  %v392_v18 = vpop.f32.mrf.mxu2  ;;  %v248_v13 = vmax.f32 %v143_v9, %v241_v35  ;;  %v146_v35 = vmax.f32 %v138_v38, 0.0 }
  0xe5   :  { %v393_v19 = vadd.f32 %v1025_v50, %v392_v18  ;;  %v351_v32 = vmax.f32 %v246_v26, %v344_v22  ;;  %v242_v39 = vmax.f32 %v230_v42, 0.0 }
  0xe6   :  { %462 = vst [vmem:[%s1100_s3] sm:$0xff] %v455_v17  ;;  %v290_v23 = vpop.f32.mrf.mxu0  ;;  %v251_v55 = vmax.f32 %v146_v35, %v244_v47 }
  0xe7   :  { %v291_v24 = vadd.f32 %v1025_v50, %v290_v23  ;;  %v430_v25 = vpop.f32.mrf.mxu3 }
  0xe8   :  { %v431_v28 = vadd.f32 %v430_v25, %v393_v19  ;;  %v328_v29 = vpop.f32.mrf.mxu1  ;;  %v97_v25 = vadd.f32 %v1025_v50, %v1008_v43  ;;  %v243_v43 = vmax.f32 %v233_v46, 0.0 }
  0xe9   :  { %v329_v51 = vadd.f32 %v328_v29, %v291_v24  ;;  %v144_v24 = vmax.f32 %v132_v16, 0.0 }
  0xea   :  { %v449_v34 = vmax.f32 %v431_v28, 0.0 }
  0xeb   :  { %v345_v33 = vmax.f32 %v329_v51, 0.0  ;;  %v249_v28 = vmax.f32 %v144_v24, %v242_v39 }
  0xec   :  { %v456_v54 = vmax.f32 %v351_v32, %v449_v34  ;;  %v395_v56 = vpop.f32.mrf.mxu2  ;;  %v135_v32 = vadd.f32 %v1012_v45, %v97_v25 }
  0xed   :  { %v396_v57 = vadd.f32 %v1025_v50, %v395_v56  ;;  %v352_v2 = vmax.f32 %v247_v62, %v345_v33 }
  0xee   :  { %463 = vst [vmem:[%s1100_s3 + $0x8] sm:$0xff] %v456_v54  ;;  %v293_v36 = vpop.f32.mrf.mxu0  ;;  %v145_v58 = vmax.f32 %v135_v32, 0.0 }
  0xef   :  { %v294_v60 = vadd.f32 %v1025_v50, %v293_v36  ;;  %v433_v61 = vpop.f32.mrf.mxu3 }
  0xf0   :  { %v434_v63 = vadd.f32 %v433_v61, %v396_v57  ;;  %v331_v0 = vpop.f32.mrf.mxu1 }
  0xf1   :  { %v332_v4 = vadd.f32 %v331_v0, %v294_v60  ;;  %v250_v60 = vmax.f32 %v145_v58, %v243_v43 }
  0xf2   :  { %v450_v3 = vmax.f32 %v434_v63, 0.0 }
  0xf3   :  { %v346_v37 = vmax.f32 %v332_v4, 0.0 }
  0xf4   :  { %v457_v6 = vmax.f32 %v352_v2, %v450_v3  ;;  %v398_v7 = vpop.f32.mrf.mxu2 }
  0xf5   :  { %v399_v8 = vadd.f32 %v1025_v50, %v398_v7  ;;  %v353_v17 = vmax.f32 %v248_v13, %v346_v37 }
  0xf6   :  { %464 = vst [vmem:[%s1100_s3 + $0x10] sm:$0xff] %v457_v6  ;;  %v296_v40 = vpop.f32.mrf.mxu0 }
  0xf7   :  { %v297_v11 = vadd.f32 %v1025_v50, %v296_v40  ;;  %v436_v12 = vpop.f32.mrf.mxu3 }
  0xf8   :  { %v437_v14 = vadd.f32 %v436_v12, %v399_v8  ;;  %v334_v15 = vpop.f32.mrf.mxu1 }
  0xf9   :  { %v335_v19 = vadd.f32 %v334_v15, %v297_v11 }
  0xfa   :  { %v451_v18 = vmax.f32 %v437_v14, 0.0 }
  0xfb   :  { %v347_v41 = vmax.f32 %v335_v19, 0.0 }
  0xfc   :  { %v458_v21 = vmax.f32 %v353_v17, %v451_v18  ;;  %v401_v22 = vpop.f32.mrf.mxu2 }
  0xfd   :  { %v402_v23 = vadd.f32 %v1025_v50, %v401_v22  ;;  %v354_v34 = vmax.f32 %v249_v28, %v347_v41 }
  0xfe   :  { %465 = vst [vmem:[%s1100_s3 + $0x18] sm:$0xff] %v458_v21  ;;  %v299_v44 = vpop.f32.mrf.mxu0 }
  0xff   :  { %v300_v26 = vadd.f32 %v1025_v50, %v299_v44  ;;  %v439_v27 = vpop.f32.mrf.mxu3 }
 0x100   :  { %v440_v29 = vadd.f32 %v439_v27, %v402_v23  ;;  %v337_v30 = vpop.f32.mrf.mxu1 }
 0x101   :  { %v338_v53 = vadd.f32 %v337_v30, %v300_v26 }
 0x102   :  { %v452_v51 = vmax.f32 %v440_v29, 0.0 }
 0x103   :  { %v348_v45 = vmax.f32 %v338_v53, 0.0 }
 0x104   :  { %v459_v54 = vmax.f32 %v354_v34, %v452_v51  ;;  %v404_v56 = vpop.f32.mrf.mxu2 }
 0x105   :  { %v405_v57 = vadd.f32 %v1025_v50, %v404_v56  ;;  %v355_v63 = vmax.f32 %v250_v60, %v348_v45 }
 0x106   :  { %466 = vst [vmem:[%s1100_s3 + $0x20] sm:$0xff] %v459_v54  ;;  %v302_v48 = vpop.f32.mrf.mxu0 }
 0x107   :  { %v303_v33 = vadd.f32 %v1025_v50, %v302_v48  ;;  %v442_v36 = vpop.f32.mrf.mxu3 }
 0x108   :  { %v443_v61 = vadd.f32 %v442_v36, %v405_v57  ;;  %v340_v62 = vpop.f32.mrf.mxu1 }
 0x109   :  { %v341_v1 = vadd.f32 %v340_v62, %v303_v33 }
 0x10a   :  { %v453_v0 = vmax.f32 %v443_v61, 0.0 }
 0x10b   :  { %v349_v5 = vmax.f32 %v341_v1, 0.0 }
 0x10c   :  { %v460_v2 = vmax.f32 %v355_v63, %v453_v0  ;;  %v407_v3 = vpop.f32.mrf.mxu2 }
 0x10d   :  { %v408_v4 = vadd.f32 %v1025_v50, %v407_v3  ;;  %v356_v8 = vmax.f32 %v251_v55, %v349_v5 }
 0x10e   :  { %467 = vst [vmem:[%s1100_s3 + $0x28] sm:$0xff] %v460_v2 }
 0x10f   :  { %v445_v6 = vpop.f32.mrf.mxu3 }
 0x110   :  { %v446_v7 = vadd.f32 %v445_v6, %v408_v4 }
 0x112   :  { %v454_v9 = vmax.f32 %v446_v7, 0.0 }
 0x114   :  { %v461_v49 = vmax.f32 %v356_v8, %v454_v9 }
 0x116   :  { %468 = vst [vmem:[%s1100_s3 + $0x30] sm:$0xff] %v461_v49 }

// kernel: thnet_forward.5
= control target key start
LH: loop header
LB: loop body
LE: loop exit
PB: predicated region body
PF: predicated region fallthrough
CT: control target
= control target key end

     0   :  { %s620_s1 = inlined_call_operand.vmem [shape: f32[512,128], index: 1, kind: input, shape index: {}]   ;;  %s621_s2 = inlined_call_operand.vmem [shape: f32[1,128], index: 2, kind: input, shape index: {}]   ;;  %s622_s0 = inlined_call_operand.vmem [shape: f32[8,512], index: 0, kind: input, shape index: {}]   ;;  %s623_s3 = inlined_call_operand.vmem [shape: f32[128,128], index: 3, kind: input, shape index: {}]   ;;  %s624_s4 = inlined_call_operand.vmem [shape: f32[1,128], index: 4, kind: input, shape index: {}]   ;;  %s625_s5 = inlined_call_operand.vmem [shape: f32[128,128], index: 5, kind: input, shape index: {}]   ;;  %s626_s6 = inlined_call_operand.vmem [shape: f32[1,128], index: 6, kind: input, shape index: {}]   ;;  %s627_s7 = inlined_call_operand.vmem [shape: f32[8,128], index: 7, kind: output, shape index: {}]  }
   0x1   :  { %v77_v0 = vld [vmem:[%s620_s1 + $0x178] sm:$0xff]  ;;  %v76_v2 = vld [vmem:[%s620_s1 + $0x170] sm:$0xff]  ;;  %v75_v6 = vld [vmem:[%s620_s1 + $0x168] sm:$0xff] }
   0x2   :  { %v45_v1 = vld [vmem:[%s620_s1 + $0x78] sm:$0xff]  ;;  %138 = vmatpush.msra.mxu2 %v77_v0  ;;  %v44_v4 = vld [vmem:[%s620_s1 + $0x70] sm:$0xff]  ;;  %v43_v8 = vld [vmem:[%s620_s1 + $0x68] sm:$0xff] }
   0x3   :  { %98 = vmatpush.msra.mxu0 %v45_v1  ;;  %v93_v3 = vld [vmem:[%s620_s1 + $0x1f8] sm:$0xff]  ;;  %v92_v7 = vld [vmem:[%s620_s1 + $0x1f0] sm:$0xff]  ;;  %v91_v10 = vld [vmem:[%s620_s1 + $0x1e8] sm:$0xff] }
   0x4   :  { %v61_v5 = vld [vmem:[%s620_s1 + $0xf8] sm:$0xff]  ;;  %158 = vmatpush.msra.mxu3 %v93_v3  ;;  %139 = vmatpush.msra.mxu2 %v76_v2  ;;  %v60_v9 = vld [vmem:[%s620_s1 + $0xf0] sm:$0xff]  ;;  %v74_v11 = vld [vmem:[%s620_s1 + $0x160] sm:$0xff] }
   0x5   :  { %118 = vmatpush.msra.mxu1 %v61_v5  ;;  %99 = vmatpush.msra.mxu0 %v44_v4  ;;  %v42_v12 = vld [vmem:[%s620_s1 + $0x60] sm:$0xff]  ;;  %v59_v13 = vld [vmem:[%s620_s1 + $0xe8] sm:$0xff]  ;;  %v73_v16 = vld [vmem:[%s620_s1 + $0x158] sm:$0xff] }
   0x6   :  { %159 = vmatpush.msra.mxu3 %v92_v7  ;;  %140 = vmatpush.msra.mxu2 %v75_v6  ;;  %v90_v14 = vld [vmem:[%s620_s1 + $0x1e0] sm:$0xff]  ;;  %v41_v17 = vld [vmem:[%s620_s1 + $0x58] sm:$0xff]  ;;  %v72_v20 = vld [vmem:[%s620_s1 + $0x150] sm:$0xff] }
   0x7   :  { %119 = vmatpush.msra.mxu1 %v60_v9  ;;  %100 = vmatpush.msra.mxu0 %v43_v8  ;;  %v58_v15 = vld [vmem:[%s620_s1 + $0xe0] sm:$0xff]  ;;  %v89_v18 = vld [vmem:[%s620_s1 + $0x1d8] sm:$0xff]  ;;  %v40_v21 = vld [vmem:[%s620_s1 + $0x50] sm:$0xff] }
   0x8   :  { %160 = vmatpush.msra.mxu3 %v91_v10  ;;  %141 = vmatpush.msra.mxu2 %v74_v11  ;;  %v57_v19 = vld [vmem:[%s620_s1 + $0xd8] sm:$0xff]  ;;  %v88_v22 = vld [vmem:[%s620_s1 + $0x1d0] sm:$0xff]  ;;  %v71_v24 = vld [vmem:[%s620_s1 + $0x148] sm:$0xff] }
   0x9   :  { %120 = vmatpush.msra.mxu1 %v59_v13  ;;  %101 = vmatpush.msra.mxu0 %v42_v12  ;;  %v56_v23 = vld [vmem:[%s620_s1 + $0xd0] sm:$0xff]  ;;  %v39_v25 = vld [vmem:[%s620_s1 + $0x48] sm:$0xff]  ;;  %v70_v28 = vld [vmem:[%s620_s1 + $0x140] sm:$0xff] }
   0xa   :  { %161 = vmatpush.msra.mxu3 %v90_v14  ;;  %142 = vmatpush.msra.mxu2 %v73_v16  ;;  %v87_v26 = vld [vmem:[%s620_s1 + $0x1c8] sm:$0xff]  ;;  %v38_v29 = vld [vmem:[%s620_s1 + $0x40] sm:$0xff]  ;;  %v69_v32 = vld [vmem:[%s620_s1 + $0x138] sm:$0xff] }
   0xb   :  { %121 = vmatpush.msra.mxu1 %v58_v15  ;;  %102 = vmatpush.msra.mxu0 %v41_v17  ;;  %v55_v27 = vld [vmem:[%s620_s1 + $0xc8] sm:$0xff]  ;;  %v86_v30 = vld [vmem:[%s620_s1 + $0x1c0] sm:$0xff]  ;;  %v37_v33 = vld [vmem:[%s620_s1 + $0x38] sm:$0xff] }
   0xc   :  { %162 = vmatpush.msra.mxu3 %v89_v18  ;;  %143 = vmatpush.msra.mxu2 %v72_v20  ;;  %v54_v31 = vld [vmem:[%s620_s1 + $0xc0] sm:$0xff]  ;;  %v85_v34 = vld [vmem:[%s620_s1 + $0x1b8] sm:$0xff]  ;;  %v68_v36 = vld [vmem:[%s620_s1 + $0x130] sm:$0xff] }
   0xd   :  { %122 = vmatpush.msra.mxu1 %v57_v19  ;;  %103 = vmatpush.msra.mxu0 %v40_v21  ;;  %v53_v35 = vld [vmem:[%s620_s1 + $0xb8] sm:$0xff]  ;;  %v36_v37 = vld [vmem:[%s620_s1 + $0x30] sm:$0xff]  ;;  %v67_v40 = vld [vmem:[%s620_s1 + $0x128] sm:$0xff] }
   0xe   :  { %163 = vmatpush.msra.mxu3 %v88_v22  ;;  %144 = vmatpush.msra.mxu2 %v71_v24  ;;  %v84_v38 = vld [vmem:[%s620_s1 + $0x1b0] sm:$0xff]  ;;  %v35_v41 = vld [vmem:[%s620_s1 + $0x28] sm:$0xff]  ;;  %v66_v44 = vld [vmem:[%s620_s1 + $0x120] sm:$0xff] }
   0xf   :  { %123 = vmatpush.msra.mxu1 %v56_v23  ;;  %104 = vmatpush.msra.mxu0 %v39_v25  ;;  %v52_v39 = vld [vmem:[%s620_s1 + $0xb0] sm:$0xff]  ;;  %v83_v42 = vld [vmem:[%s620_s1 + $0x1a8] sm:$0xff]  ;;  %v34_v45 = vld [vmem:[%s620_s1 + $0x20] sm:$0xff] }
  0x10   :  { %164 = vmatpush.msra.mxu3 %v87_v26  ;;  %145 = vmatpush.msra.mxu2 %v70_v28  ;;  %v51_v43 = vld [vmem:[%s620_s1 + $0xa8] sm:$0xff]  ;;  %v82_v46 = vld [vmem:[%s620_s1 + $0x1a0] sm:$0xff]  ;;  %v65_v48 = vld [vmem:[%s620_s1 + $0x118] sm:$0xff] }
  0x11   :  { %124 = vmatpush.msra.mxu1 %v55_v27  ;;  %105 = vmatpush.msra.mxu0 %v38_v29  ;;  %v50_v47 = vld [vmem:[%s620_s1 + $0xa0] sm:$0xff]  ;;  %v33_v49 = vld [vmem:[%s620_s1 + $0x18] sm:$0xff]  ;;  %v64_v52 = vld [vmem:[%s620_s1 + $0x110] sm:$0xff] }
  0x12   :  { %165 = vmatpush.msra.mxu3 %v86_v30  ;;  %146 = vmatpush.msra.mxu2 %v69_v32  ;;  %v81_v50 = vld [vmem:[%s620_s1 + $0x198] sm:$0xff]  ;;  %v32_v53 = vld [vmem:[%s620_s1 + $0x10] sm:$0xff]  ;;  %v63_v56 = vld [vmem:[%s620_s1 + $0x108] sm:$0xff] }
  0x13   :  { %125 = vmatpush.msra.mxu1 %v54_v31  ;;  %106 = vmatpush.msra.mxu0 %v37_v33  ;;  %v49_v51 = vld [vmem:[%s620_s1 + $0x98] sm:$0xff]  ;;  %v80_v54 = vld [vmem:[%s620_s1 + $0x190] sm:$0xff]  ;;  %v31_v57 = vld [vmem:[%s620_s1 + $0x8] sm:$0xff] }
  0x14   :  { %166 = vmatpush.msra.mxu3 %v85_v34  ;;  %147 = vmatpush.msra.mxu2 %v68_v36  ;;  %v48_v55 = vld [vmem:[%s620_s1 + $0x90] sm:$0xff]  ;;  %v79_v58 = vld [vmem:[%s620_s1 + $0x188] sm:$0xff]  ;;  %v62_v60 = vld [vmem:[%s620_s1 + $0x100] sm:$0xff] }
  0x15   :  { %126 = vmatpush.msra.mxu1 %v53_v35  ;;  %107 = vmatpush.msra.mxu0 %v36_v37  ;;  %v47_v59 = vld [vmem:[%s620_s1 + $0x88] sm:$0xff]  ;;  %v30_v61 = vld [vmem:[%s620_s1] sm:$0xff]  ;;  %v28_v62 = vld [vmem:[%s622_s0 + $0x10] sm:$0xff] }
  0x16   :  { %167 = vmatpush.msra.mxu3 %v84_v38  ;;  %148 = vmatpush.msra.mxu2 %v67_v40  ;;  %v78_v63 = vld [vmem:[%s620_s1 + $0x180] sm:$0xff]  ;;  %v29_v1 = vld [vmem:[%s622_s0 + $0x18] sm:$0xff]  ;;  %v27_v4 = vld [vmem:[%s622_s0 + $0x8] sm:$0xff] }
  0x17   :  { %127 = vmatpush.msra.mxu1 %v52_v39  ;;  %108 = vmatpush.msra.mxu0 %v35_v41  ;;  %v26_v0 = vld [vmem:[%s622_s0] sm:$0xff]  ;;  %v194_v3 = vld [vmem:[%s623_s3 + $0x78] sm:$0xff]  ;;  %v193_v5 = vld [vmem:[%s623_s3 + $0x70] sm:$0xff] }
  0x18   :  { %168 = vmatpush.msra.mxu3 %v83_v42  ;;  %149 = vmatpush.msra.mxu2 %v66_v44  ;;  %v46_v2 = vld [vmem:[%s620_s1 + $0x80] sm:$0xff]  ;;  %v192_v6 = vld [vmem:[%s623_s3 + $0x68] sm:$0xff]  ;;  %v190_v8 = vld [vmem:[%s623_s3 + $0x58] sm:$0xff] }
  0x19   :  { %128 = vmatpush.msra.mxu1 %v51_v43  ;;  %109 = vmatpush.msra.mxu0 %v34_v45  ;;  %v191_v7 = vld [vmem:[%s623_s3 + $0x60] sm:$0xff]  ;;  %v189_v9 = vld [vmem:[%s623_s3 + $0x50] sm:$0xff]  ;;  %v188_v10 = vld [vmem:[%s623_s3 + $0x48] sm:$0xff] }
  0x1a   :  { %169 = vmatpush.msra.mxu3 %v82_v46  ;;  %150 = vmatpush.msra.mxu2 %v65_v48  ;;  %v187_v11 = vld [vmem:[%s623_s3 + $0x40] sm:$0xff]  ;;  %v186_v12 = vld [vmem:[%s623_s3 + $0x38] sm:$0xff]  ;;  %v185_v13 = vld [vmem:[%s623_s3 + $0x30] sm:$0xff] }
  0x1b   :  { %129 = vmatpush.msra.mxu1 %v50_v47  ;;  %110 = vmatpush.msra.mxu0 %v33_v49  ;;  %v184_v14 = vld [vmem:[%s623_s3 + $0x28] sm:$0xff]  ;;  %v183_v15 = vld [vmem:[%s623_s3 + $0x20] sm:$0xff]  ;;  %v182_v16 = vld [vmem:[%s623_s3 + $0x18] sm:$0xff] }
  0x1c   :  { %170 = vmatpush.msra.mxu3 %v81_v50  ;;  %151 = vmatpush.msra.mxu2 %v64_v52  ;;  %v181_v17 = vld [vmem:[%s623_s3 + $0x10] sm:$0xff]  ;;  %v180_v18 = vld [vmem:[%s623_s3 + $0x8] sm:$0xff]  ;;  %v179_v19 = vld [vmem:[%s623_s3] sm:$0xff] }
  0x1d   :  { %130 = vmatpush.msra.mxu1 %v49_v51  ;;  %111 = vmatpush.msra.mxu0 %v32_v53  ;;  %v235_v20 = vld [vmem:[%s625_s5 + $0x78] sm:$0xff]  ;;  %v234_v21 = vld [vmem:[%s625_s5 + $0x70] sm:$0xff]  ;;  %v233_v22 = vld [vmem:[%s625_s5 + $0x68] sm:$0xff] }
  0x1e   :  { %171 = vmatpush.msra.mxu3 %v80_v54  ;;  %152 = vmatpush.msra.mxu2 %v63_v56  ;;  %v232_v23 = vld [vmem:[%s625_s5 + $0x60] sm:$0xff]  ;;  %v231_v24 = vld [vmem:[%s625_s5 + $0x58] sm:$0xff]  ;;  %v230_v25 = vld [vmem:[%s625_s5 + $0x50] sm:$0xff] }
  0x1f   :  { %131 = vmatpush.msra.mxu1 %v48_v55  ;;  %112 = vmatpush.msra.mxu0 %v31_v57  ;;  %v229_v26 = vld [vmem:[%s625_s5 + $0x48] sm:$0xff]  ;;  %v228_v27 = vld [vmem:[%s625_s5 + $0x40] sm:$0xff]  ;;  %v227_v28 = vld [vmem:[%s625_s5 + $0x38] sm:$0xff] }
  0x20   :  { %172 = vmatpush.msra.mxu3 %v79_v58  ;;  %153 = vmatpush.msra.mxu2 %v62_v60  ;;  %v226_v29 = vld [vmem:[%s625_s5 + $0x30] sm:$0xff]  ;;  %v265_v30 = vld [vmem:[%s621_s2] ss:$0 sm:$0xff]  ;;  %v225_v31 = vld [vmem:[%s625_s5 + $0x28] sm:$0xff] }
  0x21   :  { %132 = vmatpush.msra.mxu1 %v47_v59  ;;  %113 = vmatpush.msra.mxu0 %v30_v61  ;;  %v224_v33 = vld [vmem:[%s625_s5 + $0x20] sm:$0xff]  ;;  %v223_v36 = vld [vmem:[%s625_s5 + $0x18] sm:$0xff]  ;;  %v222_v43 = vld [vmem:[%s625_s5 + $0x10] sm:$0xff] }
  0x22   :  { %154 = vmatmul.f32.vlgmr.msra.gmra.mxu2 %v28_v62  ;;  %173 = vmatpush.msra.mxu3 %v78_v63  ;;  %v221_v44 = vld [vmem:[%s625_s5 + $0x8] sm:$0xff]  ;;  %v220_v45 = vld [vmem:[%s625_s5] sm:$0xff] }
  0x23   :  { %114 = vmatmul.f32.vlgmr.msra.gmra.mxu0 %v26_v0  ;;  %174 = vmatmul.f32.vlgmr.msra.gmra.mxu3 %v29_v1  ;;  %v266_v46 = vld [vmem:[%s624_s4] ss:$0 sm:$0xff] }
  0x24   :  { %133 = vmatpush.msra.mxu1 %v46_v2  ;;  %199 = vmatpush.msrb.mxu0 %v194_v3  ;;  %v267_v50 = vld [vmem:[%s626_s6] ss:$0 sm:$0xff] }
  0x25   :  { %134 = vmatmul.f32.vlgmr.msra.gmra.mxu1 %v27_v4 }
  0x26   :  { %200 = vmatpush.msrb.mxu0 %v193_v5  ;;  %240 = vmatpush.msrb.mxu1 %v235_v20 }
  0x28   :  { %201 = vmatpush.msrb.mxu0 %v192_v6  ;;  %241 = vmatpush.msrb.mxu1 %v234_v21 }
  0x2a   :  { %202 = vmatpush.msrb.mxu0 %v191_v7  ;;  %242 = vmatpush.msrb.mxu1 %v233_v22 }
  0x2c   :  { %203 = vmatpush.msrb.mxu0 %v190_v8  ;;  %243 = vmatpush.msrb.mxu1 %v232_v23 }
  0x2e   :  { %204 = vmatpush.msrb.mxu0 %v189_v9  ;;  %244 = vmatpush.msrb.mxu1 %v231_v24 }
  0x30   :  { %205 = vmatpush.msrb.mxu0 %v188_v10  ;;  %245 = vmatpush.msrb.mxu1 %v230_v25 }
  0x32   :  { %206 = vmatpush.msrb.mxu0 %v187_v11  ;;  %246 = vmatpush.msrb.mxu1 %v229_v26 }
  0x34   :  { %207 = vmatpush.msrb.mxu0 %v186_v12  ;;  %247 = vmatpush.msrb.mxu1 %v228_v27 }
  0x36   :  { %208 = vmatpush.msrb.mxu0 %v185_v13  ;;  %248 = vmatpush.msrb.mxu1 %v227_v28 }
  0x38   :  { %209 = vmatpush.msrb.mxu0 %v184_v14  ;;  %249 = vmatpush.msrb.mxu1 %v226_v29 }
  0x3a   :  { %210 = vmatpush.msrb.mxu0 %v183_v15  ;;  %250 = vmatpush.msrb.mxu1 %v225_v31 }
  0x3c   :  { %211 = vmatpush.msrb.mxu0 %v182_v16  ;;  %251 = vmatpush.msrb.mxu1 %v224_v33 }
  0x3e   :  { %212 = vmatpush.msrb.mxu0 %v181_v17  ;;  %252 = vmatpush.msrb.mxu1 %v223_v36 }
  0x40   :  { %213 = vmatpush.msrb.mxu0 %v180_v18  ;;  %253 = vmatpush.msrb.mxu1 %v222_v43 }
  0x42   :  { %214 = vmatpush.msrb.mxu0 %v179_v19  ;;  %254 = vmatpush.msrb.mxu1 %v221_v44 }
  0x44   :  { %255 = vmatpush.msrb.mxu1 %v220_v45 }
  0xa0   :  { %v115_v32 = vpop.f32.mrf.mxu0 }
  0xa1   :  { %v116_v34 = vadd.f32 %v265_v30, %v115_v32 }
  0xa2   :  { %v135_v35 = vpop.f32.mrf.mxu1 }
  0xa3   :  { %v136_v37 = vadd.f32 %v135_v35, %v116_v34 }
  0xa5   :  { %v155_v38 = vpop.f32.mrf.mxu2 }
  0xa6   :  { %v156_v39 = vadd.f32 %v155_v38, %v136_v37  ;;  %v175_v40 = vpop.f32.mrf.mxu3 }
  0xa8   :  { %v176_v41 = vadd.f32 %v175_v40, %v156_v39 }
  0xaa   :  { %v178_v42 = vmax.f32 %v176_v41, 0.0 }
  0xac   :  { %215 = vmatmul.f32.vlgmr.msrb.gmra.mxu0 %v178_v42 }
 0x129   :  { %v216_v47 = vpop.f32.mrf.mxu0 }
 0x12a   :  { %v217_v48 = vadd.f32 %v266_v46, %v216_v47 }
 0x12c   :  { %v219_v49 = vmax.f32 %v217_v48, 0.0 }
 0x12e   :  { %256 = vmatmul.f32.vlgmr.msrb.gmra.mxu1 %v219_v49 }
 0x1ab   :  { %v257_v51 = vpop.f32.mrf.mxu1 }
 0x1ac   :  { %v258_v52 = vadd.f32 %v267_v50, %v257_v51 }
 0x1ae   :  { %260 = vst [vmem:[%s627_s7] sm:$0xff] %v258_v52 }

</bundles_post_ra>
